<compile_context>
chip_gen: v5e
topology: v5e:2x2
jax: 0.10.0
libtpu: 0.0.40
codegen_flags: <defaults>
</compile_context>

<pallas_src>
import functools
import inspect
import math

import numpy as np

import jax
import jax.numpy as jnp
from jax.experimental import pallas as pl
from jax.experimental.pallas import tpu as pltpu


def transformer_block_kernel(x_ref, ln1_g_ref, ln1_b_ref, wqkv_ref,
                             wp_ref, bp_ref, ln2_g_ref, ln2_b_ref,
                             w1_ref, b1_ref, w2_ref, b2_ref, o_ref,
                             qkv_ref, attn_ref, *,
                             num_heads, eps, seq_len, batch_tile, group_heads):
    C = x_ref.shape[1]
    hd = C // num_heads
    gcols = group_heads * hd                     # lane width of one head group
    n_groups = num_heads // group_heads
    mm = wqkv_ref.dtype                          # MXU operand dtype (bf16 by default)

    x = x_ref[...].astype(jnp.float32)           # (rows, C), rows = batch_tile*seq_len

    def layer_norm(t, g_ref, b_ref):
        g = g_ref[...].astype(jnp.float32)
        b = b_ref[...].astype(jnp.float32)
        mu = jnp.mean(t, axis=-1, keepdims=True)
        d = t - mu
        var = jnp.mean(d * d, axis=-1, keepdims=True)
        return d * jax.lax.rsqrt(var + eps) * g + b

    # ---- pre-LN 1 + QKV projection (single MXU matmul; q-scale folded into wqkv) ----
    h = layer_norm(x, ln1_g_ref, ln1_b_ref)
    qkv_ref[...] = jnp.dot(h.astype(mm), wqkv_ref[...],
                           preferred_element_type=jnp.float32).astype(mm)

    # ---- multi-head self-attention ----
    # Heads are processed in lane-dense groups of `group_heads` heads so every
    # attn_ref store covers group_heads*hd lanes (128 for typical ViT head dims).
    # The batch-item loop is a real loop (bounds live ranges); lane offsets are
    # static Python ints.  Every (row, col) of attn_ref is overwritten each grid
    # step before the projection reads it, so no zero-init is required.
    # TODO(synk): for long T2T-ViT token sequences, tile over KV blocks with an
    # online softmax so the per-head (N, N) score matrix stays bounded in VMEM
    # (mandatory on v7x's 64 MiB VMEM).
    def attend(r0):
        rows_sl = pl.ds(r0, seq_len)
        for g in range(n_groups):                # static -> static lane offsets
            c0 = g * gcols
            q_g = qkv_ref[rows_sl, c0:c0 + gcols]
            k_g = qkv_ref[rows_sl, C + c0:C + c0 + gcols]
            v_g = qkv_ref[rows_sl, 2 * C + c0:2 * C + c0 + gcols]
            outs = []
            for hh in range(group_heads):
                sl = slice(hh * hd, (hh + 1) * hd)
                qh, kh, vh = q_g[:, sl], k_g[:, sl], v_g[:, sl]
                # contract last dims directly: no explicit k transpose
                s = jax.lax.dot_general(qh, kh, (((1,), (1,)), ((), ())),
                                        preferred_element_type=jnp.float32)
                s = s - jnp.max(s, axis=-1, keepdims=True)
                p = jnp.exp(s)
                p = p * pl.reciprocal(jnp.sum(p, axis=-1, keepdims=True),
                                      approx=True)
                outs.append(jnp.dot(p.astype(mm), vh,
                                    preferred_element_type=jnp.float32))
            grp = outs[0] if group_heads == 1 else jnp.concatenate(outs, axis=-1)
            attn_ref[rows_sl, c0:c0 + gcols] = grp.astype(mm)   # lane-dense store

    if batch_tile == 1:
        attend(0)                                # fully static offsets
    else:
        @pl.loop(0, batch_tile)
        def _(b):
            attend(pl.multiple_of(b * seq_len, seq_len))

    proj = (jnp.dot(attn_ref[...], wp_ref[...], preferred_element_type=jnp.float32)
            + bp_ref[...].astype(jnp.float32))
    x = x + proj                                 # attention/projection dropout == identity

    # ---- pre-LN 2 + MLP ----
    h = layer_norm(x, ln2_g_ref, ln2_b_ref)
    h = (jnp.dot(h.astype(mm), w1_ref[...], preferred_element_type=jnp.float32)
         + b1_ref[...].astype(jnp.float32))
    # exact (erf-based) GELU in f32, matching torch.nn.GELU() default.
    # (A tanh-approx GELU would shift work to the EUP on v5e but changes numerics.)
    h = 0.5 * h * (1.0 + jax.lax.erf(h * (1.0 / math.sqrt(2.0))))
    h = (jnp.dot(h.astype(mm), w2_ref[...], preferred_element_type=jnp.float32)
         + b2_ref[...].astype(jnp.float32))
    o_ref[...] = (x + h).astype(o_ref.dtype)


def _head_group_size(num_heads, head_dim, lane=128):
    """Largest divisor of num_heads whose combined lane width is <= 128."""
    limit = max(1, lane // max(head_dim, 1))
    best = 1
    for d in range(1, num_heads + 1):
        if num_heads % d == 0 and d <= limit:
            best = d
    return best


def _pick_batch_tile(B, N, *, target_rows, min_grid=2, sublane=8):
    """Divisor Bt of B: rows=Bt*N fills the MXU M axis, stays within the target
    slab, keeps the block layout-legal (rows % 8 == 0 or the full array) and
    keeps >= min_grid grid steps (megacore / v7x dual-TC sharding)."""
    divisors = [d for d in range(1, B + 1) if B % d == 0]
    legal = lambda d: (d * N) % sublane == 0 or d == B
    fits = lambda d: d * N <= max(target_rows, N)
    grid_ok = lambda d: (B // d) >= min_grid or B < min_grid
    for pred, pick in (
            (lambda d: legal(d) and fits(d) and grid_ok(d), max),
            (lambda d: legal(d) and fits(d), max),
            (lambda d: legal(d) and grid_ok(d), min),
            (legal, min)):
        cand = [d for d in divisors if pred(d)]
        if cand:
            return pick(cand)
    return B


def _supports_single_buffering():
    if not hasattr(pl, "Buffered"):
        return False
    try:
        return "pipeline_mode" in inspect.signature(pl.BlockSpec).parameters
    except (TypeError, ValueError):
        return False


_CAN_SINGLE_BUFFER = _supports_single_buffering()


def _const_spec(shape, single_buffer):
    zeros = (0,) * len(shape)
    index_map = lambda i, _z=zeros: _z
    if single_buffer and _CAN_SINGLE_BUFFER:
        # Constant index_map -> one buffer is enough; the saved VMEM funds bigger slabs.
        return pl.BlockSpec(shape, index_map, pipeline_mode=pl.Buffered(1))
    return pl.BlockSpec(shape, index_map)


def transformer_block(x, params, *, num_heads, eps=1e-5, mxu_dtype=jnp.bfloat16):
    B, N, C = x.shape
    Hm = params["w1"].shape[-1]
    hd = C // num_heads
    mm = np.dtype(mxu_dtype)

    # ---- generation-aware VMEM budget / row-slab sizing ----
    try:
        vmem_cap = int(pltpu.get_tpu_info().vmem_capacity_bytes)
    except Exception:
        vmem_cap = 64 * 1024 * 1024            # conservative (v7x-sized) default
    vmem_limit = min(vmem_cap * 3 // 4, 100 * 1024 * 1024)
    target_rows = 512 if vmem_cap >= 96 * 1024 * 1024 else 256

    Bt = _pick_batch_tile(B, N, target_rows=target_rows, min_grid=2)
    rows = Bt * N
    G = _head_group_size(num_heads, hd)

    # ---- one-time parameter transforms (wrapper-side, not per grid step) ----
    scale = hd ** (-0.5)
    wqkv = params["wqkv"].astype(jnp.float32).at[:, :C].multiply(scale).astype(mm)
    wp = params["wp"].astype(mm)
    w1 = params["w1"].astype(mm)
    w2 = params["w2"].astype(mm)
    f32v = lambda k: params[k].reshape(1, -1).astype(jnp.float32)
    ln1_g, ln1_b, bp = f32v("ln1_g"), f32v("ln1_b"), f32v("bp")
    ln2_g, ln2_b, b1, b2 = f32v("ln2_g"), f32v("ln2_b"), f32v("b1"), f32v("b2")

    x2d = x.reshape(B * N, C)

    kern = functools.partial(transformer_block_kernel, num_heads=num_heads,
                             eps=eps, seq_len=N, batch_tile=Bt, group_heads=G)

    flops = (2 * B * N * C * 3 * C              # qkv projection
             + 4 * B * num_heads * N * N * hd   # scores + PV
             + 2 * B * N * C * C                # output projection
             + 4 * B * N * C * Hm)              # mlp fc1 + fc2
    transcendentals = B * num_heads * N * N + B * N * Hm
    bytes_accessed = (2 * B * N * C * x.dtype.itemsize
                      + (3 * C * C + C * C + 2 * C * Hm) * mm.itemsize)
    cost = pl.CostEstimate(flops=int(flops), transcendentals=int(transcendentals),
                           bytes_accessed=int(bytes_accessed))

    def build(single_buffer):
        cs = lambda shape: _const_spec(shape, single_buffer)
        return pl.pallas_call(
            kern,
            out_shape=jax.ShapeDtypeStruct((B * N, C), x.dtype),
            grid=(B // Bt,),
            in_specs=[
                pl.BlockSpec((rows, C), lambda i: (i, 0)),     # x row slab
                cs((1, C)), cs((1, C)),                        # ln1 gamma / beta
                cs((C, 3 * C)),                                # qkv weight (q pre-scaled)
                cs((C, C)), cs((1, C)),                        # proj weight / bias
                cs((1, C)), cs((1, C)),                        # ln2 gamma / beta
                cs((C, Hm)), cs((1, Hm)),                      # mlp fc1 weight / bias
                cs((Hm, C)), cs((1, C)),                       # mlp fc2 weight / bias
            ],
            out_specs=pl.BlockSpec((rows, C), lambda i: (i, 0)),
            scratch_shapes=[pltpu.VMEM((rows, 3 * C), mm),     # qkv slab (mm dtype)
                            pltpu.VMEM((rows, C), mm)],        # attention output slab
            compiler_params=pltpu.CompilerParams(
                dimension_semantics=("parallel",),
                vmem_limit_bytes=int(vmem_limit)),
            cost_estimate=cost,
        )

    args = (x2d, ln1_g, ln1_b, wqkv, wp, bp, ln2_g, ln2_b, w1, b1, w2, b2)
    try:
        out2d = build(True)(*args)
    except Exception:
        # Fallback: default double-buffered constants if pl.Buffered(1) is rejected.
        out2d = build(False)(*args)
    return out2d.reshape(B, N, C)


def reference(x, params, *, num_heads, eps=1e-5):
    """Pure-JAX reference mirroring the PyTorch forward (eval mode)."""
    def ln(v, g, b):
        mu = jnp.mean(v, axis=-1, keepdims=True)
        var = jnp.mean((v - mu) ** 2, axis=-1, keepdims=True)
        return (v - mu) / jnp.sqrt(var + eps) * g + b

    B, N, C = x.shape
    hd = C // num_heads
    h = ln(x, params["ln1_g"], params["ln1_b"])
    qkv = h @ params["wqkv"]                                        # (B,N,3C)
    qkv = qkv.reshape(B, N, 3, num_heads, hd).transpose(2, 0, 3, 1, 4)
    q, k, v = qkv[0], qkv[1], qkv[2]                                # (B,H,N,hd)
    sim = jnp.einsum("bhnd,bhmd->bhnm", q, k) * hd ** (-0.5)
    p = jax.nn.softmax(sim, axis=-1)
    o = jnp.einsum("bhnm,bhmd->bhnd", p, v).transpose(0, 2, 1, 3).reshape(B, N, C)
    o = o @ params["wp"] + params["bp"]
    x = x + o
    h = ln(x, params["ln2_g"], params["ln2_b"])
    h = h @ params["w1"] + params["b1"]
    h = 0.5 * h * (1.0 + jax.lax.erf(h / math.sqrt(2.0)))
    h = h @ params["w2"] + params["b2"]
    return x + h


if __name__ == "__main__":
    C = 32
    num_heads = 4
    Hm = 4 * C

    key = jax.random.PRNGKey(0)
    ks = jax.random.split(key, 10)
    params = {
        "ln1_g": 1.0 + 0.05 * jax.random.normal(ks[0], (1, C), jnp.float32),
        "ln1_b": 0.05 * jax.random.normal(ks[1], (1, C), jnp.float32),
        "wqkv":  0.05 * jax.random.normal(ks[2], (C, 3 * C), jnp.float32),
        "wp":    0.05 * jax.random.normal(ks[3], (C, C), jnp.float32),
        "bp":    0.05 * jax.random.normal(ks[4], (1, C), jnp.float32),
        "ln2_g": 1.0 + 0.05 * jax.random.normal(ks[5], (1, C), jnp.float32),
        "ln2_b": 0.05 * jax.random.normal(ks[6], (1, C), jnp.float32),
        "w1":    0.05 * jax.random.normal(ks[7], (C, Hm), jnp.float32),
        "b1":    0.05 * jax.random.normal(ks[8], (1, Hm), jnp.float32),
        "w2":    0.05 * jax.random.normal(ks[9], (Hm, C), jnp.float32),
        "b2":    jnp.zeros((1, C), jnp.float32),
    }

    # 1) f32 MXU path: tight check against the pure-JAX reference.
    B, N = 2, 8
    x = jax.random.normal(jax.random.PRNGKey(42), (B, N, C), jnp.float32)
    out = jax.block_until_ready(
        transformer_block(x, params, num_heads=num_heads, mxu_dtype=jnp.float32))
    ref = jax.block_until_ready(reference(x, params, num_heads=num_heads))
    assert out.shape == (B, N, C)
    err = float(jnp.max(jnp.abs(out - ref)))
    assert jnp.allclose(out, ref, atol=3e-3, rtol=3e-3), err

    # 2) default bf16-MXU path on f32 activations (the performance default).
    out_mx = jax.block_until_ready(transformer_block(x, params, num_heads=num_heads))
    assert out_mx.shape == (B, N, C) and out_mx.dtype == x.dtype
    assert bool(jnp.all(jnp.isfinite(out_mx)))
    assert float(jnp.max(jnp.abs(out_mx - ref))) < 0.1

    # 3) larger batch: exercises batch_tile > 1 (dynamic per-item attention loop)
    #    and a multi-step "parallel" grid axis.
    B2, N2 = 4, 8
    x2 = jax.random.normal(jax.random.PRNGKey(7), (B2, N2, C), jnp.float32)
    out2 = jax.block_until_ready(
        transformer_block(x2, params, num_heads=num_heads, mxu_dtype=jnp.float32))
    ref2 = jax.block_until_ready(reference(x2, params, num_heads=num_heads))
    assert jnp.allclose(out2, ref2, atol=3e-3, rtol=3e-3), \
        float(jnp.max(jnp.abs(out2 - ref2)))

    # 4) bf16 checkpoint + bf16 activations: sanity check only (bf16 rounding).
    params_bf16 = {k_: v_.astype(jnp.bfloat16) for k_, v_ in params.items()}
    out_bf16 = jax.block_until_ready(
        transformer_block(x.astype(jnp.bfloat16), params_bf16, num_heads=num_heads))
    assert out_bf16.shape == (B, N, C) and out_bf16.dtype == jnp.bfloat16
    assert bool(jnp.all(jnp.isfinite(out_bf16.astype(jnp.float32))))
    assert float(jnp.max(jnp.abs(out_bf16.astype(jnp.float32) - ref))) < 0.12

    print("KERNEL_OK")
</pallas_src>

<mosaic_0001>
module attributes {stable_mosaic.version = 11 : i64} {
  func.func @transformer_block_kernel(%arg0: i32, %arg1: memref<8x32xf32, #tpu.memory_space<vmem>>, %arg2: memref<1x32xf32, #tpu.memory_space<vmem>>, %arg3: memref<1x32xf32, #tpu.memory_space<vmem>>, %arg4: memref<32x96xf32, #tpu.memory_space<vmem>>, %arg5: memref<32x32xf32, #tpu.memory_space<vmem>>, %arg6: memref<1x32xf32, #tpu.memory_space<vmem>>, %arg7: memref<1x32xf32, #tpu.memory_space<vmem>>, %arg8: memref<1x32xf32, #tpu.memory_space<vmem>>, %arg9: memref<32x128xf32, #tpu.memory_space<vmem>>, %arg10: memref<1x128xf32, #tpu.memory_space<vmem>>, %arg11: memref<128x32xf32, #tpu.memory_space<vmem>>, %arg12: memref<1x32xf32, #tpu.memory_space<vmem>>, %arg13: memref<8x32xf32, #tpu.memory_space<vmem>>, %arg14: memref<8x96xf32, #tpu.memory_space<vmem>>, %arg15: memref<8x32xf32, #tpu.memory_space<vmem>>) attributes {dimension_semantics = [#tpu.dimension_semantics<parallel>], iteration_bounds = array<i64: 2>, scalar_prefetch = 0 : i64, scratch_operands = 2 : i64, tpu.core_type = #tpu.core_type<tc>, window_params = [{transform_indices = @transform_0, window_bounds = array<i64: 8, 32>}, {pipeline_mode = #tpu.pipeline_mode<synchronous>, transform_indices = @transform_1, window_bounds = array<i64: 1, 32>}, {pipeline_mode = #tpu.pipeline_mode<synchronous>, transform_indices = @transform_2, window_bounds = array<i64: 1, 32>}, {pipeline_mode = #tpu.pipeline_mode<synchronous>, transform_indices = @transform_3, window_bounds = array<i64: 32, 96>}, {pipeline_mode = #tpu.pipeline_mode<synchronous>, transform_indices = @transform_4, window_bounds = array<i64: 32, 32>}, {pipeline_mode = #tpu.pipeline_mode<synchronous>, transform_indices = @transform_5, window_bounds = array<i64: 1, 32>}, {pipeline_mode = #tpu.pipeline_mode<synchronous>, transform_indices = @transform_6, window_bounds = array<i64: 1, 32>}, {pipeline_mode = #tpu.pipeline_mode<synchronous>, transform_indices = @transform_7, window_bounds = array<i64: 1, 32>}, {pipeline_mode = #tpu.pipeline_mode<synchronous>, transform_indices = @transform_8, window_bounds = array<i64: 32, 128>}, {pipeline_mode = #tpu.pipeline_mode<synchronous>, transform_indices = @transform_9, window_bounds = array<i64: 1, 128>}, {pipeline_mode = #tpu.pipeline_mode<synchronous>, transform_indices = @transform_10, window_bounds = array<i64: 128, 32>}, {pipeline_mode = #tpu.pipeline_mode<synchronous>, transform_indices = @transform_11, window_bounds = array<i64: 1, 32>}, {transform_indices = @transform_12, window_bounds = array<i64: 8, 32>}]} {
    %c0 = arith.constant 0 : index
    %c0_0 = arith.constant 0 : index
    %0 = vector.load %arg1[%c0, %c0_0] : memref<8x32xf32, #tpu.memory_space<vmem>>, vector<8x32xf32>
    %c0_1 = arith.constant 0 : index
    %c0_2 = arith.constant 0 : index
    %1 = vector.load %arg2[%c0_1, %c0_2] : memref<1x32xf32, #tpu.memory_space<vmem>>, vector<1x32xf32>
    %c0_3 = arith.constant 0 : index
    %c0_4 = arith.constant 0 : index
    %2 = vector.load %arg3[%c0_3, %c0_4] : memref<1x32xf32, #tpu.memory_space<vmem>>, vector<1x32xf32>
    %cst = arith.constant dense<0.000000e+00> : vector<8xf32>
    %3 = vector.multi_reduction <add>, %0, %cst [1] : vector<8x32xf32> to vector<8xf32>
    %4 = vector.shape_cast %3 : vector<8xf32> to vector<8x1xf32>
    %cst_5 = arith.constant 3.200000e+01 : f32
    %5 = vector.broadcast %cst_5 : f32 to vector<8x1xf32>
    %6 = arith.divf %4, %5 : vector<8x1xf32>
    %7 = vector.broadcast %6 : vector<8x1xf32> to vector<8x32xf32>
    %8 = arith.subf %0, %7 : vector<8x32xf32>
    %9 = arith.mulf %8, %8 : vector<8x32xf32>
    %cst_6 = arith.constant dense<0.000000e+00> : vector<8xf32>
    %10 = vector.multi_reduction <add>, %9, %cst_6 [1] : vector<8x32xf32> to vector<8xf32>
    %11 = vector.shape_cast %10 : vector<8xf32> to vector<8x1xf32>
    %cst_7 = arith.constant 3.200000e+01 : f32
    %12 = vector.broadcast %cst_7 : f32 to vector<8x1xf32>
    %13 = arith.divf %11, %12 : vector<8x1xf32>
    %cst_8 = arith.constant 9.99999974E-6 : f32
    %14 = vector.broadcast %cst_8 : f32 to vector<8x1xf32>
    %15 = arith.addf %13, %14 : vector<8x1xf32>
    %16 = math.rsqrt %15 : vector<8x1xf32>
    %17 = vector.broadcast %16 : vector<8x1xf32> to vector<8x32xf32>
    %18 = arith.mulf %8, %17 : vector<8x32xf32>
    %19 = vector.broadcast %1 : vector<1x32xf32> to vector<8x32xf32>
    %20 = arith.mulf %18, %19 : vector<8x32xf32>
    %21 = vector.broadcast %2 : vector<1x32xf32> to vector<8x32xf32>
    %22 = arith.addf %20, %21 : vector<8x32xf32>
    %c0_9 = arith.constant 0 : index
    %c0_10 = arith.constant 0 : index
    %23 = vector.load %arg4[%c0_9, %c0_10] : memref<32x96xf32, #tpu.memory_space<vmem>>, vector<32x96xf32>
    %cst_11 = arith.constant dense<0.000000e+00> : vector<8x96xf32>
    %24 = tpu.matmul %22, %23, %cst_11 {dimension_numbers = #tpu.dot_dimension_numbers<[1], [0], [0], [1], [0, 0, 1, 1], [], []>} : vector<8x32xf32>, vector<32x96xf32>, vector<8x96xf32> -> vector<8x96xf32>
    %c0_12 = arith.constant 0 : index
    %c0_13 = arith.constant 0 : index
    %25 = vector.load %arg14[%c0_12, %c0_13] : memref<8x96xf32, #tpu.memory_space<vmem>>, vector<8x96xf32>
    tpu.vector_store %arg14[%c0_12, %c0_13], %24 {strides = array<i32>} : memref<8x96xf32, #tpu.memory_space<vmem>>, vector<8x96xf32>,
    %c0_14 = arith.constant 0 : index
    %c0_15 = arith.constant 0 : index
    %26 = vector.load %arg14[%c0_14, %c0_15] : memref<8x96xf32, #tpu.memory_space<vmem>>, vector<8x32xf32>
    %c0_16 = arith.constant 0 : index
    %c32 = arith.constant 32 : index
    %27 = vector.load %arg14[%c0_16, %c32] : memref<8x96xf32, #tpu.memory_space<vmem>>, vector<8x32xf32>
    %c0_17 = arith.constant 0 : index
    %c64 = arith.constant 64 : index
    %28 = vector.load %arg14[%c0_17, %c64] : memref<8x96xf32, #tpu.memory_space<vmem>>, vector<8x32xf32>
    %29 = vector.extract_strided_slice %26 {offsets = [0, 0], sizes = [8, 8], strides = [1, 1]} : vector<8x32xf32> to vector<8x8xf32>
    %30 = vector.extract_strided_slice %27 {offsets = [0, 0], sizes = [8, 8], strides = [1, 1]} : vector<8x32xf32> to vector<8x8xf32>
    %31 = vector.extract_strided_slice %28 {offsets = [0, 0], sizes = [8, 8], strides = [1, 1]} : vector<8x32xf32> to vector<8x8xf32>
    %cst_18 = arith.constant dense<0.000000e+00> : vector<8x8xf32>
    %32 = tpu.matmul %29, %30, %cst_18 {dimension_numbers = #tpu.dot_dimension_numbers<[1], [1], [0], [0], [0, 0, 1, 0], [], []>} : vector<8x8xf32>, vector<8x8xf32>, vector<8x8xf32> -> vector<8x8xf32>
    %cst_19 = arith.constant dense<0xFF800000> : vector<8xf32>
    %33 = vector.multi_reduction <maximumf>, %32, %cst_19 [1] : vector<8x8xf32> to vector<8xf32>
    %34 = vector.shape_cast %33 : vector<8xf32> to vector<8x1xf32>
    %35 = vector.broadcast %34 : vector<8x1xf32> to vector<8x8xf32>
    %36 = arith.subf %32, %35 : vector<8x8xf32>
    %37 = math.exp %36 : vector<8x8xf32>
    %cst_20 = arith.constant dense<0.000000e+00> : vector<8xf32>
    %38 = vector.multi_reduction <add>, %37, %cst_20 [1] : vector<8x8xf32> to vector<8xf32>
    %39 = vector.shape_cast %38 : vector<8xf32> to vector<8x1xf32>
    %40 = tpu.reciprocal %39 {approx = true} : vector<8x1xf32> -> vector<8x1xf32>
    %41 = vector.broadcast %40 : vector<8x1xf32> to vector<8x8xf32>
    %42 = arith.mulf %37, %41 : vector<8x8xf32>
    %cst_21 = arith.constant dense<0.000000e+00> : vector<8x8xf32>
    %43 = tpu.matmul %42, %31, %cst_21 {dimension_numbers = #tpu.dot_dimension_numbers<[1], [0], [0], [1], [0, 0, 1, 1], [], []>} : vector<8x8xf32>, vector<8x8xf32>, vector<8x8xf32> -> vector<8x8xf32>
    %44 = vector.extract_strided_slice %26 {offsets = [0, 8], sizes = [8, 8], strides = [1, 1]} : vector<8x32xf32> to vector<8x8xf32>
    %45 = vector.extract_strided_slice %27 {offsets = [0, 8], sizes = [8, 8], strides = [1, 1]} : vector<8x32xf32> to vector<8x8xf32>
    %46 = vector.extract_strided_slice %28 {offsets = [0, 8], sizes = [8, 8], strides = [1, 1]} : vector<8x32xf32> to vector<8x8xf32>
    %cst_22 = arith.constant dense<0.000000e+00> : vector<8x8xf32>
    %47 = tpu.matmul %44, %45, %cst_22 {dimension_numbers = #tpu.dot_dimension_numbers<[1], [1], [0], [0], [0, 0, 1, 0], [], []>} : vector<8x8xf32>, vector<8x8xf32>, vector<8x8xf32> -> vector<8x8xf32>
    %cst_23 = arith.constant dense<0xFF800000> : vector<8xf32>
    %48 = vector.multi_reduction <maximumf>, %47, %cst_23 [1] : vector<8x8xf32> to vector<8xf32>
    %49 = vector.shape_cast %48 : vector<8xf32> to vector<8x1xf32>
    %50 = vector.broadcast %49 : vector<8x1xf32> to vector<8x8xf32>
    %51 = arith.subf %47, %50 : vector<8x8xf32>
    %52 = math.exp %51 : vector<8x8xf32>
    %cst_24 = arith.constant dense<0.000000e+00> : vector<8xf32>
    %53 = vector.multi_reduction <add>, %52, %cst_24 [1] : vector<8x8xf32> to vector<8xf32>
    %54 = vector.shape_cast %53 : vector<8xf32> to vector<8x1xf32>
    %55 = tpu.reciprocal %54 {approx = true} : vector<8x1xf32> -> vector<8x1xf32>
    %56 = vector.broadcast %55 : vector<8x1xf32> to vector<8x8xf32>
    %57 = arith.mulf %52, %56 : vector<8x8xf32>
    %cst_25 = arith.constant dense<0.000000e+00> : vector<8x8xf32>
    %58 = tpu.matmul %57, %46, %cst_25 {dimension_numbers = #tpu.dot_dimension_numbers<[1], [0], [0], [1], [0, 0, 1, 1], [], []>} : vector<8x8xf32>, vector<8x8xf32>, vector<8x8xf32> -> vector<8x8xf32>
    %59 = vector.extract_strided_slice %26 {offsets = [0, 16], sizes = [8, 8], strides = [1, 1]} : vector<8x32xf32> to vector<8x8xf32>
    %60 = vector.extract_strided_slice %27 {offsets = [0, 16], sizes = [8, 8], strides = [1, 1]} : vector<8x32xf32> to vector<8x8xf32>
    %61 = vector.extract_strided_slice %28 {offsets = [0, 16], sizes = [8, 8], strides = [1, 1]} : vector<8x32xf32> to vector<8x8xf32>
    %cst_26 = arith.constant dense<0.000000e+00> : vector<8x8xf32>
    %62 = tpu.matmul %59, %60, %cst_26 {dimension_numbers = #tpu.dot_dimension_numbers<[1], [1], [0], [0], [0, 0, 1, 0], [], []>} : vector<8x8xf32>, vector<8x8xf32>, vector<8x8xf32> -> vector<8x8xf32>
    %cst_27 = arith.constant dense<0xFF800000> : vector<8xf32>
    %63 = vector.multi_reduction <maximumf>, %62, %cst_27 [1] : vector<8x8xf32> to vector<8xf32>
    %64 = vector.shape_cast %63 : vector<8xf32> to vector<8x1xf32>
    %65 = vector.broadcast %64 : vector<8x1xf32> to vector<8x8xf32>
    %66 = arith.subf %62, %65 : vector<8x8xf32>
    %67 = math.exp %66 : vector<8x8xf32>
    %cst_28 = arith.constant dense<0.000000e+00> : vector<8xf32>
    %68 = vector.multi_reduction <add>, %67, %cst_28 [1] : vector<8x8xf32> to vector<8xf32>
    %69 = vector.shape_cast %68 : vector<8xf32> to vector<8x1xf32>
    %70 = tpu.reciprocal %69 {approx = true} : vector<8x1xf32> -> vector<8x1xf32>
    %71 = vector.broadcast %70 : vector<8x1xf32> to vector<8x8xf32>
    %72 = arith.mulf %67, %71 : vector<8x8xf32>
    %cst_29 = arith.constant dense<0.000000e+00> : vector<8x8xf32>
    %73 = tpu.matmul %72, %61, %cst_29 {dimension_numbers = #tpu.dot_dimension_numbers<[1], [0], [0], [1], [0, 0, 1, 1], [], []>} : vector<8x8xf32>, vector<8x8xf32>, vector<8x8xf32> -> vector<8x8xf32>
    %74 = vector.extract_strided_slice %26 {offsets = [0, 24], sizes = [8, 8], strides = [1, 1]} : vector<8x32xf32> to vector<8x8xf32>
    %75 = vector.extract_strided_slice %27 {offsets = [0, 24], sizes = [8, 8], strides = [1, 1]} : vector<8x32xf32> to vector<8x8xf32>
    %76 = vector.extract_strided_slice %28 {offsets = [0, 24], sizes = [8, 8], strides = [1, 1]} : vector<8x32xf32> to vector<8x8xf32>
    %cst_30 = arith.constant dense<0.000000e+00> : vector<8x8xf32>
    %77 = tpu.matmul %74, %75, %cst_30 {dimension_numbers = #tpu.dot_dimension_numbers<[1], [1], [0], [0], [0, 0, 1, 0], [], []>} : vector<8x8xf32>, vector<8x8xf32>, vector<8x8xf32> -> vector<8x8xf32>
    %cst_31 = arith.constant dense<0xFF800000> : vector<8xf32>
    %78 = vector.multi_reduction <maximumf>, %77, %cst_31 [1] : vector<8x8xf32> to vector<8xf32>
    %79 = vector.shape_cast %78 : vector<8xf32> to vector<8x1xf32>
    %80 = vector.broadcast %79 : vector<8x1xf32> to vector<8x8xf32>
    %81 = arith.subf %77, %80 : vector<8x8xf32>
    %82 = math.exp %81 : vector<8x8xf32>
    %cst_32 = arith.constant dense<0.000000e+00> : vector<8xf32>
    %83 = vector.multi_reduction <add>, %82, %cst_32 [1] : vector<8x8xf32> to vector<8xf32>
    %84 = vector.shape_cast %83 : vector<8xf32> to vector<8x1xf32>
    %85 = tpu.reciprocal %84 {approx = true} : vector<8x1xf32> -> vector<8x1xf32>
    %86 = vector.broadcast %85 : vector<8x1xf32> to vector<8x8xf32>
    %87 = arith.mulf %82, %86 : vector<8x8xf32>
    %cst_33 = arith.constant dense<0.000000e+00> : vector<8x8xf32>
    %88 = tpu.matmul %87, %76, %cst_33 {dimension_numbers = #tpu.dot_dimension_numbers<[1], [0], [0], [1], [0, 0, 1, 1], [], []>} : vector<8x8xf32>, vector<8x8xf32>, vector<8x8xf32> -> vector<8x8xf32>
    %89 = tpu.concatenate %43, %58, %73, %88 in 1 : vector<8x8xf32>, vector<8x8xf32>, vector<8x8xf32>, vector<8x8xf32> -> vector<8x32xf32>
    %c0_34 = arith.constant 0 : index
    %c0_35 = arith.constant 0 : index
    %90 = vector.load %arg15[%c0_34, %c0_35] : memref<8x32xf32, #tpu.memory_space<vmem>>, vector<8x32xf32>
    tpu.vector_store %arg15[%c0_34, %c0_35], %89 {strides = array<i32>} : memref<8x32xf32, #tpu.memory_space<vmem>>, vector<8x32xf32>,
    %c0_36 = arith.constant 0 : index
    %c0_37 = arith.constant 0 : index
    %91 = vector.load %arg15[%c0_36, %c0_37] : memref<8x32xf32, #tpu.memory_space<vmem>>, vector<8x32xf32>
    %c0_38 = arith.constant 0 : index
    %c0_39 = arith.constant 0 : index
    %92 = vector.load %arg5[%c0_38, %c0_39] : memref<32x32xf32, #tpu.memory_space<vmem>>, vector<32x32xf32>
    %cst_40 = arith.constant dense<0.000000e+00> : vector<8x32xf32>
    %93 = tpu.matmul %91, %92, %cst_40 {dimension_numbers = #tpu.dot_dimension_numbers<[1], [0], [0], [1], [0, 0, 1, 1], [], []>} : vector<8x32xf32>, vector<32x32xf32>, vector<8x32xf32> -> vector<8x32xf32>
    %c0_41 = arith.constant 0 : index
    %c0_42 = arith.constant 0 : index
    %94 = vector.load %arg6[%c0_41, %c0_42] : memref<1x32xf32, #tpu.memory_space<vmem>>, vector<1x32xf32>
    %95 = vector.broadcast %94 : vector<1x32xf32> to vector<8x32xf32>
    %96 = arith.addf %93, %95 : vector<8x32xf32>
    %97 = arith.addf %0, %96 : vector<8x32xf32>
    %c0_43 = arith.constant 0 : index
    %c0_44 = arith.constant 0 : index
    %98 = vector.load %arg7[%c0_43, %c0_44] : memref<1x32xf32, #tpu.memory_space<vmem>>, vector<1x32xf32>
    %c0_45 = arith.constant 0 : index
    %c0_46 = arith.constant 0 : index
    %99 = vector.load %arg8[%c0_45, %c0_46] : memref<1x32xf32, #tpu.memory_space<vmem>>, vector<1x32xf32>
    %cst_47 = arith.constant dense<0.000000e+00> : vector<8xf32>
    %100 = vector.multi_reduction <add>, %97, %cst_47 [1] : vector<8x32xf32> to vector<8xf32>
    %101 = vector.shape_cast %100 : vector<8xf32> to vector<8x1xf32>
    %cst_48 = arith.constant 3.200000e+01 : f32
    %102 = vector.broadcast %cst_48 : f32 to vector<8x1xf32>
    %103 = arith.divf %101, %102 : vector<8x1xf32>
    %104 = vector.broadcast %103 : vector<8x1xf32> to vector<8x32xf32>
    %105 = arith.subf %97, %104 : vector<8x32xf32>
    %106 = arith.mulf %105, %105 : vector<8x32xf32>
    %cst_49 = arith.constant dense<0.000000e+00> : vector<8xf32>
    %107 = vector.multi_reduction <add>, %106, %cst_49 [1] : vector<8x32xf32> to vector<8xf32>
    %108 = vector.shape_cast %107 : vector<8xf32> to vector<8x1xf32>
    %cst_50 = arith.constant 3.200000e+01 : f32
    %109 = vector.broadcast %cst_50 : f32 to vector<8x1xf32>
    %110 = arith.divf %108, %109 : vector<8x1xf32>
    %cst_51 = arith.constant 9.99999974E-6 : f32
    %111 = vector.broadcast %cst_51 : f32 to vector<8x1xf32>
    %112 = arith.addf %110, %111 : vector<8x1xf32>
    %113 = math.rsqrt %112 : vector<8x1xf32>
    %114 = vector.broadcast %113 : vector<8x1xf32> to vector<8x32xf32>
    %115 = arith.mulf %105, %114 : vector<8x32xf32>
    %116 = vector.broadcast %98 : vector<1x32xf32> to vector<8x32xf32>
    %117 = arith.mulf %115, %116 : vector<8x32xf32>
    %118 = vector.broadcast %99 : vector<1x32xf32> to vector<8x32xf32>
    %119 = arith.addf %117, %118 : vector<8x32xf32>
    %c0_52 = arith.constant 0 : index
    %c0_53 = arith.constant 0 : index
    %120 = vector.load %arg9[%c0_52, %c0_53] : memref<32x128xf32, #tpu.memory_space<vmem>>, vector<32x128xf32>
    %cst_54 = arith.constant dense<0.000000e+00> : vector<8x128xf32>
    %121 = tpu.matmul %119, %120, %cst_54 {dimension_numbers = #tpu.dot_dimension_numbers<[1], [0], [0], [1], [0, 0, 1, 1], [], []>} : vector<8x32xf32>, vector<32x128xf32>, vector<8x128xf32> -> vector<8x128xf32>
    %c0_55 = arith.constant 0 : index
    %c0_56 = arith.constant 0 : index
    %122 = vector.load %arg10[%c0_55, %c0_56] : memref<1x128xf32, #tpu.memory_space<vmem>>, vector<1x128xf32>
    %123 = vector.broadcast %122 : vector<1x128xf32> to vector<8x128xf32>
    %124 = arith.addf %121, %123 : vector<8x128xf32>
    %cst_57 = arith.constant 5.000000e-01 : f32
    %125 = vector.broadcast %cst_57 : f32 to vector<8x128xf32>
    %126 = arith.mulf %125, %124 : vector<8x128xf32>
    %cst_58 = arith.constant 0.707106769 : f32
    %127 = vector.broadcast %cst_58 : f32 to vector<8x128xf32>
    %128 = arith.mulf %124, %127 : vector<8x128xf32>
    %129 = math.erf %128 : vector<8x128xf32>
    %cst_59 = arith.constant 1.000000e+00 : f32
    %130 = vector.broadcast %cst_59 : f32 to vector<8x128xf32>
    %131 = arith.addf %130, %129 : vector<8x128xf32>
    %132 = arith.mulf %126, %131 : vector<8x128xf32>
    %c0_60 = arith.constant 0 : index
    %c0_61 = arith.constant 0 : index
    %133 = vector.load %arg11[%c0_60, %c0_61] : memref<128x32xf32, #tpu.memory_space<vmem>>, vector<128x32xf32>
    %cst_62 = arith.constant dense<0.000000e+00> : vector<8x32xf32>
    %134 = tpu.matmul %132, %133, %cst_62 {dimension_numbers = #tpu.dot_dimension_numbers<[1], [0], [0], [1], [0, 0, 1, 1], [], []>} : vector<8x128xf32>, vector<128x32xf32>, vector<8x32xf32> -> vector<8x32xf32>
    %c0_63 = arith.constant 0 : index
    %c0_64 = arith.constant 0 : index
    %135 = vector.load %arg12[%c0_63, %c0_64] : memref<1x32xf32, #tpu.memory_space<vmem>>, vector<1x32xf32>
    %136 = vector.broadcast %135 : vector<1x32xf32> to vector<8x32xf32>
    %137 = arith.addf %134, %136 : vector<8x32xf32>
    %138 = arith.addf %97, %137 : vector<8x32xf32>
    %c0_65 = arith.constant 0 : index
    %c0_66 = arith.constant 0 : index
    %139 = vector.load %arg13[%c0_65, %c0_66] : memref<8x32xf32, #tpu.memory_space<vmem>>, vector<8x32xf32>
    tpu.vector_store %arg13[%c0_65, %c0_66], %138 {strides = array<i32>} : memref<8x32xf32, #tpu.memory_space<vmem>>, vector<8x32xf32>,
    return
  }
  func.func @transform_0(%arg0: i32) -> (i32, i32) {
    %c0_i32 = arith.constant 0 : i32
    %c0_i32_0 = arith.constant 0 : i32
    return %arg0, %c0_i32 : i32, i32
  }
  func.func @transform_1(%arg0: i32) -> (i32, i32) {
    %c0_i32 = arith.constant 0 : i32
    %c0_i32_0 = arith.constant 0 : i32
    %c0_i32_1 = arith.constant 0 : i32
    return %c0_i32, %c0_i32_0 : i32, i32
  }
  func.func @transform_2(%arg0: i32) -> (i32, i32) {
    %c0_i32 = arith.constant 0 : i32
    %c0_i32_0 = arith.constant 0 : i32
    %c0_i32_1 = arith.constant 0 : i32
    return %c0_i32, %c0_i32_0 : i32, i32
  }
  func.func @transform_3(%arg0: i32) -> (i32, i32) {
    %c0_i32 = arith.constant 0 : i32
    %c0_i32_0 = arith.constant 0 : i32
    %c0_i32_1 = arith.constant 0 : i32
    return %c0_i32, %c0_i32_0 : i32, i32
  }
  func.func @transform_4(%arg0: i32) -> (i32, i32) {
    %c0_i32 = arith.constant 0 : i32
    %c0_i32_0 = arith.constant 0 : i32
    %c0_i32_1 = arith.constant 0 : i32
    return %c0_i32, %c0_i32_0 : i32, i32
  }
  func.func @transform_5(%arg0: i32) -> (i32, i32) {
    %c0_i32 = arith.constant 0 : i32
    %c0_i32_0 = arith.constant 0 : i32
    %c0_i32_1 = arith.constant 0 : i32
    return %c0_i32, %c0_i32_0 : i32, i32
  }
  func.func @transform_6(%arg0: i32) -> (i32, i32) {
    %c0_i32 = arith.constant 0 : i32
    %c0_i32_0 = arith.constant 0 : i32
    %c0_i32_1 = arith.constant 0 : i32
    return %c0_i32, %c0_i32_0 : i32, i32
  }
  func.func @transform_7(%arg0: i32) -> (i32, i32) {
    %c0_i32 = arith.constant 0 : i32
    %c0_i32_0 = arith.constant 0 : i32
    %c0_i32_1 = arith.constant 0 : i32
    return %c0_i32, %c0_i32_0 : i32, i32
  }
  func.func @transform_8(%arg0: i32) -> (i32, i32) {
    %c0_i32 = arith.constant 0 : i32
    %c0_i32_0 = arith.constant 0 : i32
    %c0_i32_1 = arith.constant 0 : i32
    return %c0_i32, %c0_i32_0 : i32, i32
  }
  func.func @transform_9(%arg0: i32) -> (i32, i32) {
    %c0_i32 = arith.constant 0 : i32
    %c0_i32_0 = arith.constant 0 : i32
    %c0_i32_1 = arith.constant 0 : i32
    return %c0_i32, %c0_i32_0 : i32, i32
  }
  func.func @transform_10(%arg0: i32) -> (i32, i32) {
    %c0_i32 = arith.constant 0 : i32
    %c0_i32_0 = arith.constant 0 : i32
    %c0_i32_1 = arith.constant 0 : i32
    return %c0_i32, %c0_i32_0 : i32, i32
  }
  func.func @transform_11(%arg0: i32) -> (i32, i32) {
    %c0_i32 = arith.constant 0 : i32
    %c0_i32_0 = arith.constant 0 : i32
    %c0_i32_1 = arith.constant 0 : i32
    return %c0_i32, %c0_i32_0 : i32, i32
  }
  func.func @transform_12(%arg0: i32) -> (i32, i32) {
    %c0_i32 = arith.constant 0 : i32
    %c0_i32_0 = arith.constant 0 : i32
    return %arg0, %c0_i32 : i32, i32
  }
}

module attributes {stable_mosaic.version = 11 : i64} {
  func.func @transformer_block_kernel(%arg0: i32, %arg1: memref<8x32xf32, #tpu.memory_space<vmem>>, %arg2: memref<1x32xf32, #tpu.memory_space<vmem>>, %arg3: memref<1x32xf32, #tpu.memory_space<vmem>>, %arg4: memref<32x96xf32, #tpu.memory_space<vmem>>, %arg5: memref<32x32xf32, #tpu.memory_space<vmem>>, %arg6: memref<1x32xf32, #tpu.memory_space<vmem>>, %arg7: memref<1x32xf32, #tpu.memory_space<vmem>>, %arg8: memref<1x32xf32, #tpu.memory_space<vmem>>, %arg9: memref<32x128xf32, #tpu.memory_space<vmem>>, %arg10: memref<1x128xf32, #tpu.memory_space<vmem>>, %arg11: memref<128x32xf32, #tpu.memory_space<vmem>>, %arg12: memref<1x32xf32, #tpu.memory_space<vmem>>, %arg13: memref<8x32xf32, #tpu.memory_space<vmem>>, %arg14: memref<8x96xf32, #tpu.memory_space<vmem>>, %arg15: memref<8x32xf32, #tpu.memory_space<vmem>>) attributes {dimension_semantics = [#tpu.dimension_semantics<parallel>], iteration_bounds = array<i64: 2>, scalar_prefetch = 0 : i64, scratch_operands = 2 : i64, tpu.core_type = #tpu.core_type<tc>, window_params = [{transform_indices = @transform_0, window_bounds = array<i64: 8, 32>}, {pipeline_mode = #tpu.pipeline_mode<synchronous>, transform_indices = @transform_1, window_bounds = array<i64: 1, 32>}, {pipeline_mode = #tpu.pipeline_mode<synchronous>, transform_indices = @transform_2, window_bounds = array<i64: 1, 32>}, {pipeline_mode = #tpu.pipeline_mode<synchronous>, transform_indices = @transform_3, window_bounds = array<i64: 32, 96>}, {pipeline_mode = #tpu.pipeline_mode<synchronous>, transform_indices = @transform_4, window_bounds = array<i64: 32, 32>}, {pipeline_mode = #tpu.pipeline_mode<synchronous>, transform_indices = @transform_5, window_bounds = array<i64: 1, 32>}, {pipeline_mode = #tpu.pipeline_mode<synchronous>, transform_indices = @transform_6, window_bounds = array<i64: 1, 32>}, {pipeline_mode = #tpu.pipeline_mode<synchronous>, transform_indices = @transform_7, window_bounds = array<i64: 1, 32>}, {pipeline_mode = #tpu.pipeline_mode<synchronous>, transform_indices = @transform_8, window_bounds = array<i64: 32, 128>}, {pipeline_mode = #tpu.pipeline_mode<synchronous>, transform_indices = @transform_9, window_bounds = array<i64: 1, 128>}, {pipeline_mode = #tpu.pipeline_mode<synchronous>, transform_indices = @transform_10, window_bounds = array<i64: 128, 32>}, {pipeline_mode = #tpu.pipeline_mode<synchronous>, transform_indices = @transform_11, window_bounds = array<i64: 1, 32>}, {transform_indices = @transform_12, window_bounds = array<i64: 8, 32>}]} {
    %c0 = arith.constant 0 : index
    %c0_0 = arith.constant 0 : index
    %0 = vector.load %arg1[%c0, %c0_0] : memref<8x32xf32, #tpu.memory_space<vmem>>, vector<8x32xf32>
    %c0_1 = arith.constant 0 : index
    %c0_2 = arith.constant 0 : index
    %1 = vector.load %arg2[%c0_1, %c0_2] : memref<1x32xf32, #tpu.memory_space<vmem>>, vector<1x32xf32>
    %c0_3 = arith.constant 0 : index
    %c0_4 = arith.constant 0 : index
    %2 = vector.load %arg3[%c0_3, %c0_4] : memref<1x32xf32, #tpu.memory_space<vmem>>, vector<1x32xf32>
    %cst = arith.constant dense<0.000000e+00> : vector<8xf32>
    %3 = vector.multi_reduction <add>, %0, %cst [1] : vector<8x32xf32> to vector<8xf32>
    %4 = vector.shape_cast %3 : vector<8xf32> to vector<8x1xf32>
    %cst_5 = arith.constant 3.200000e+01 : f32
    %5 = vector.broadcast %cst_5 : f32 to vector<8x1xf32>
    %6 = arith.divf %4, %5 : vector<8x1xf32>
    %7 = vector.broadcast %6 : vector<8x1xf32> to vector<8x32xf32>
    %8 = arith.subf %0, %7 : vector<8x32xf32>
    %9 = arith.mulf %8, %8 : vector<8x32xf32>
    %cst_6 = arith.constant dense<0.000000e+00> : vector<8xf32>
    %10 = vector.multi_reduction <add>, %9, %cst_6 [1] : vector<8x32xf32> to vector<8xf32>
    %11 = vector.shape_cast %10 : vector<8xf32> to vector<8x1xf32>
    %cst_7 = arith.constant 3.200000e+01 : f32
    %12 = vector.broadcast %cst_7 : f32 to vector<8x1xf32>
    %13 = arith.divf %11, %12 : vector<8x1xf32>
    %cst_8 = arith.constant 9.99999974E-6 : f32
    %14 = vector.broadcast %cst_8 : f32 to vector<8x1xf32>
    %15 = arith.addf %13, %14 : vector<8x1xf32>
    %16 = math.rsqrt %15 : vector<8x1xf32>
    %17 = vector.broadcast %16 : vector<8x1xf32> to vector<8x32xf32>
    %18 = arith.mulf %8, %17 : vector<8x32xf32>
    %19 = vector.broadcast %1 : vector<1x32xf32> to vector<8x32xf32>
    %20 = arith.mulf %18, %19 : vector<8x32xf32>
    %21 = vector.broadcast %2 : vector<1x32xf32> to vector<8x32xf32>
    %22 = arith.addf %20, %21 : vector<8x32xf32>
    %c0_9 = arith.constant 0 : index
    %c0_10 = arith.constant 0 : index
    %23 = vector.load %arg4[%c0_9, %c0_10] : memref<32x96xf32, #tpu.memory_space<vmem>>, vector<32x96xf32>
    %cst_11 = arith.constant dense<0.000000e+00> : vector<8x96xf32>
    %24 = tpu.matmul %22, %23, %cst_11 {dimension_numbers = #tpu.dot_dimension_numbers<[1], [0], [0], [1], [0, 0, 1, 1], [], []>} : vector<8x32xf32>, vector<32x96xf32>, vector<8x96xf32> -> vector<8x96xf32>
    %c0_12 = arith.constant 0 : index
    %c0_13 = arith.constant 0 : index
    %25 = vector.load %arg14[%c0_12, %c0_13] : memref<8x96xf32, #tpu.memory_space<vmem>>, vector<8x96xf32>
    tpu.vector_store %arg14[%c0_12, %c0_13], %24 {strides = array<i32>} : memref<8x96xf32, #tpu.memory_space<vmem>>, vector<8x96xf32>,
    %c0_14 = arith.constant 0 : index
    %c0_15 = arith.constant 0 : index
    %26 = vector.load %arg14[%c0_14, %c0_15] : memref<8x96xf32, #tpu.memory_space<vmem>>, vector<8x32xf32>
    %c0_16 = arith.constant 0 : index
    %c32 = arith.constant 32 : index
    %27 = vector.load %arg14[%c0_16, %c32] : memref<8x96xf32, #tpu.memory_space<vmem>>, vector<8x32xf32>
    %c0_17 = arith.constant 0 : index
    %c64 = arith.constant 64 : index
    %28 = vector.load %arg14[%c0_17, %c64] : memref<8x96xf32, #tpu.memory_space<vmem>>, vector<8x32xf32>
    %29 = vector.extract_strided_slice %26 {offsets = [0, 0], sizes = [8, 8], strides = [1, 1]} : vector<8x32xf32> to vector<8x8xf32>
    %30 = vector.extract_strided_slice %27 {offsets = [0, 0], sizes = [8, 8], strides = [1, 1]} : vector<8x32xf32> to vector<8x8xf32>
    %31 = vector.extract_strided_slice %28 {offsets = [0, 0], sizes = [8, 8], strides = [1, 1]} : vector<8x32xf32> to vector<8x8xf32>
    %cst_18 = arith.constant dense<0.000000e+00> : vector<8x8xf32>
    %32 = tpu.matmul %29, %30, %cst_18 {dimension_numbers = #tpu.dot_dimension_numbers<[1], [1], [0], [0], [0, 0, 1, 0], [], []>} : vector<8x8xf32>, vector<8x8xf32>, vector<8x8xf32> -> vector<8x8xf32>
    %cst_19 = arith.constant dense<0xFF800000> : vector<8xf32>
    %33 = vector.multi_reduction <maximumf>, %32, %cst_19 [1] : vector<8x8xf32> to vector<8xf32>
    %34 = vector.shape_cast %33 : vector<8xf32> to vector<8x1xf32>
    %35 = vector.broadcast %34 : vector<8x1xf32> to vector<8x8xf32>
    %36 = arith.subf %32, %35 : vector<8x8xf32>
    %37 = math.exp %36 : vector<8x8xf32>
    %cst_20 = arith.constant dense<0.000000e+00> : vector<8xf32>
    %38 = vector.multi_reduction <add>, %37, %cst_20 [1] : vector<8x8xf32> to vector<8xf32>
    %39 = vector.shape_cast %38 : vector<8xf32> to vector<8x1xf32>
    %40 = tpu.reciprocal %39 {approx = true} : vector<8x1xf32> -> vector<8x1xf32>
    %41 = vector.broadcast %40 : vector<8x1xf32> to vector<8x8xf32>
    %42 = arith.mulf %37, %41 : vector<8x8xf32>
    %cst_21 = arith.constant dense<0.000000e+00> : vector<8x8xf32>
    %43 = tpu.matmul %42, %31, %cst_21 {dimension_numbers = #tpu.dot_dimension_numbers<[1], [0], [0], [1], [0, 0, 1, 1], [], []>} : vector<8x8xf32>, vector<8x8xf32>, vector<8x8xf32> -> vector<8x8xf32>
    %44 = vector.extract_strided_slice %26 {offsets = [0, 8], sizes = [8, 8], strides = [1, 1]} : vector<8x32xf32> to vector<8x8xf32>
    %45 = vector.extract_strided_slice %27 {offsets = [0, 8], sizes = [8, 8], strides = [1, 1]} : vector<8x32xf32> to vector<8x8xf32>
    %46 = vector.extract_strided_slice %28 {offsets = [0, 8], sizes = [8, 8], strides = [1, 1]} : vector<8x32xf32> to vector<8x8xf32>
    %cst_22 = arith.constant dense<0.000000e+00> : vector<8x8xf32>
    %47 = tpu.matmul %44, %45, %cst_22 {dimension_numbers = #tpu.dot_dimension_numbers<[1], [1], [0], [0], [0, 0, 1, 0], [], []>} : vector<8x8xf32>, vector<8x8xf32>, vector<8x8xf32> -> vector<8x8xf32>
    %cst_23 = arith.constant dense<0xFF800000> : vector<8xf32>
    %48 = vector.multi_reduction <maximumf>, %47, %cst_23 [1] : vector<8x8xf32> to vector<8xf32>
    %49 = vector.shape_cast %48 : vector<8xf32> to vector<8x1xf32>
    %50 = vector.broadcast %49 : vector<8x1xf32> to vector<8x8xf32>
    %51 = arith.subf %47, %50 : vector<8x8xf32>
    %52 = math.exp %51 : vector<8x8xf32>
    %cst_24 = arith.constant dense<0.000000e+00> : vector<8xf32>
    %53 = vector.multi_reduction <add>, %52, %cst_24 [1] : vector<8x8xf32> to vector<8xf32>
    %54 = vector.shape_cast %53 : vector<8xf32> to vector<8x1xf32>
    %55 = tpu.reciprocal %54 {approx = true} : vector<8x1xf32> -> vector<8x1xf32>
    %56 = vector.broadcast %55 : vector<8x1xf32> to vector<8x8xf32>
    %57 = arith.mulf %52, %56 : vector<8x8xf32>
    %cst_25 = arith.constant dense<0.000000e+00> : vector<8x8xf32>
    %58 = tpu.matmul %57, %46, %cst_25 {dimension_numbers = #tpu.dot_dimension_numbers<[1], [0], [0], [1], [0, 0, 1, 1], [], []>} : vector<8x8xf32>, vector<8x8xf32>, vector<8x8xf32> -> vector<8x8xf32>
    %59 = vector.extract_strided_slice %26 {offsets = [0, 16], sizes = [8, 8], strides = [1, 1]} : vector<8x32xf32> to vector<8x8xf32>
    %60 = vector.extract_strided_slice %27 {offsets = [0, 16], sizes = [8, 8], strides = [1, 1]} : vector<8x32xf32> to vector<8x8xf32>
    %61 = vector.extract_strided_slice %28 {offsets = [0, 16], sizes = [8, 8], strides = [1, 1]} : vector<8x32xf32> to vector<8x8xf32>
    %cst_26 = arith.constant dense<0.000000e+00> : vector<8x8xf32>
    %62 = tpu.matmul %59, %60, %cst_26 {dimension_numbers = #tpu.dot_dimension_numbers<[1], [1], [0], [0], [0, 0, 1, 0], [], []>} : vector<8x8xf32>, vector<8x8xf32>, vector<8x8xf32> -> vector<8x8xf32>
    %cst_27 = arith.constant dense<0xFF800000> : vector<8xf32>
    %63 = vector.multi_reduction <maximumf>, %62, %cst_27 [1] : vector<8x8xf32> to vector<8xf32>
    %64 = vector.shape_cast %63 : vector<8xf32> to vector<8x1xf32>
    %65 = vector.broadcast %64 : vector<8x1xf32> to vector<8x8xf32>
    %66 = arith.subf %62, %65 : vector<8x8xf32>
    %67 = math.exp %66 : vector<8x8xf32>
    %cst_28 = arith.constant dense<0.000000e+00> : vector<8xf32>
    %68 = vector.multi_reduction <add>, %67, %cst_28 [1] : vector<8x8xf32> to vector<8xf32>
    %69 = vector.shape_cast %68 : vector<8xf32> to vector<8x1xf32>
    %70 = tpu.reciprocal %69 {approx = true} : vector<8x1xf32> -> vector<8x1xf32>
    %71 = vector.broadcast %70 : vector<8x1xf32> to vector<8x8xf32>
    %72 = arith.mulf %67, %71 : vector<8x8xf32>
    %cst_29 = arith.constant dense<0.000000e+00> : vector<8x8xf32>
    %73 = tpu.matmul %72, %61, %cst_29 {dimension_numbers = #tpu.dot_dimension_numbers<[1], [0], [0], [1], [0, 0, 1, 1], [], []>} : vector<8x8xf32>, vector<8x8xf32>, vector<8x8xf32> -> vector<8x8xf32>
    %74 = vector.extract_strided_slice %26 {offsets = [0, 24], sizes = [8, 8], strides = [1, 1]} : vector<8x32xf32> to vector<8x8xf32>
    %75 = vector.extract_strided_slice %27 {offsets = [0, 24], sizes = [8, 8], strides = [1, 1]} : vector<8x32xf32> to vector<8x8xf32>
    %76 = vector.extract_strided_slice %28 {offsets = [0, 24], sizes = [8, 8], strides = [1, 1]} : vector<8x32xf32> to vector<8x8xf32>
    %cst_30 = arith.constant dense<0.000000e+00> : vector<8x8xf32>
    %77 = tpu.matmul %74, %75, %cst_30 {dimension_numbers = #tpu.dot_dimension_numbers<[1], [1], [0], [0], [0, 0, 1, 0], [], []>} : vector<8x8xf32>, vector<8x8xf32>, vector<8x8xf32> -> vector<8x8xf32>
    %cst_31 = arith.constant dense<0xFF800000> : vector<8xf32>
    %78 = vector.multi_reduction <maximumf>, %77, %cst_31 [1] : vector<8x8xf32> to vector<8xf32>
    %79 = vector.shape_cast %78 : vector<8xf32> to vector<8x1xf32>
    %80 = vector.broadcast %79 : vector<8x1xf32> to vector<8x8xf32>
    %81 = arith.subf %77, %80 : vector<8x8xf32>
    %82 = math.exp %81 : vector<8x8xf32>
    %cst_32 = arith.constant dense<0.000000e+00> : vector<8xf32>
    %83 = vector.multi_reduction <add>, %82, %cst_32 [1] : vector<8x8xf32> to vector<8xf32>
    %84 = vector.shape_cast %83 : vector<8xf32> to vector<8x1xf32>
    %85 = tpu.reciprocal %84 {approx = true} : vector<8x1xf32> -> vector<8x1xf32>
    %86 = vector.broadcast %85 : vector<8x1xf32> to vector<8x8xf32>
    %87 = arith.mulf %82, %86 : vector<8x8xf32>
    %cst_33 = arith.constant dense<0.000000e+00> : vector<8x8xf32>
    %88 = tpu.matmul %87, %76, %cst_33 {dimension_numbers = #tpu.dot_dimension_numbers<[1], [0], [0], [1], [0, 0, 1, 1], [], []>} : vector<8x8xf32>, vector<8x8xf32>, vector<8x8xf32> -> vector<8x8xf32>
    %89 = tpu.concatenate %43, %58, %73, %88 in 1 : vector<8x8xf32>, vector<8x8xf32>, vector<8x8xf32>, vector<8x8xf32> -> vector<8x32xf32>
    %c0_34 = arith.constant 0 : index
    %c0_35 = arith.constant 0 : index
    %90 = vector.load %arg15[%c0_34, %c0_35] : memref<8x32xf32, #tpu.memory_space<vmem>>, vector<8x32xf32>
    tpu.vector_store %arg15[%c0_34, %c0_35], %89 {strides = array<i32>} : memref<8x32xf32, #tpu.memory_space<vmem>>, vector<8x32xf32>,
    %c0_36 = arith.constant 0 : index
    %c0_37 = arith.constant 0 : index
    %91 = vector.load %arg15[%c0_36, %c0_37] : memref<8x32xf32, #tpu.memory_space<vmem>>, vector<8x32xf32>
    %c0_38 = arith.constant 0 : index
    %c0_39 = arith.constant 0 : index
    %92 = vector.load %arg5[%c0_38, %c0_39] : memref<32x32xf32, #tpu.memory_space<vmem>>, vector<32x32xf32>
    %cst_40 = arith.constant dense<0.000000e+00> : vector<8x32xf32>
    %93 = tpu.matmul %91, %92, %cst_40 {dimension_numbers = #tpu.dot_dimension_numbers<[1], [0], [0], [1], [0, 0, 1, 1], [], []>} : vector<8x32xf32>, vector<32x32xf32>, vector<8x32xf32> -> vector<8x32xf32>
    %c0_41 = arith.constant 0 : index
    %c0_42 = arith.constant 0 : index
    %94 = vector.load %arg6[%c0_41, %c0_42] : memref<1x32xf32, #tpu.memory_space<vmem>>, vector<1x32xf32>
    %95 = vector.broadcast %94 : vector<1x32xf32> to vector<8x32xf32>
    %96 = arith.addf %93, %95 : vector<8x32xf32>
    %97 = arith.addf %0, %96 : vector<8x32xf32>
    %c0_43 = arith.constant 0 : index
    %c0_44 = arith.constant 0 : index
    %98 = vector.load %arg7[%c0_43, %c0_44] : memref<1x32xf32, #tpu.memory_space<vmem>>, vector<1x32xf32>
    %c0_45 = arith.constant 0 : index
    %c0_46 = arith.constant 0 : index
    %99 = vector.load %arg8[%c0_45, %c0_46] : memref<1x32xf32, #tpu.memory_space<vmem>>, vector<1x32xf32>
    %cst_47 = arith.constant dense<0.000000e+00> : vector<8xf32>
    %100 = vector.multi_reduction <add>, %97, %cst_47 [1] : vector<8x32xf32> to vector<8xf32>
    %101 = vector.shape_cast %100 : vector<8xf32> to vector<8x1xf32>
    %cst_48 = arith.constant 3.200000e+01 : f32
    %102 = vector.broadcast %cst_48 : f32 to vector<8x1xf32>
    %103 = arith.divf %101, %102 : vector<8x1xf32>
    %104 = vector.broadcast %103 : vector<8x1xf32> to vector<8x32xf32>
    %105 = arith.subf %97, %104 : vector<8x32xf32>
    %106 = arith.mulf %105, %105 : vector<8x32xf32>
    %cst_49 = arith.constant dense<0.000000e+00> : vector<8xf32>
    %107 = vector.multi_reduction <add>, %106, %cst_49 [1] : vector<8x32xf32> to vector<8xf32>
    %108 = vector.shape_cast %107 : vector<8xf32> to vector<8x1xf32>
    %cst_50 = arith.constant 3.200000e+01 : f32
    %109 = vector.broadcast %cst_50 : f32 to vector<8x1xf32>
    %110 = arith.divf %108, %109 : vector<8x1xf32>
    %cst_51 = arith.constant 9.99999974E-6 : f32
    %111 = vector.broadcast %cst_51 : f32 to vector<8x1xf32>
    %112 = arith.addf %110, %111 : vector<8x1xf32>
    %113 = math.rsqrt %112 : vector<8x1xf32>
    %114 = vector.broadcast %113 : vector<8x1xf32> to vector<8x32xf32>
    %115 = arith.mulf %105, %114 : vector<8x32xf32>
    %116 = vector.broadcast %98 : vector<1x32xf32> to vector<8x32xf32>
    %117 = arith.mulf %115, %116 : vector<8x32xf32>
    %118 = vector.broadcast %99 : vector<1x32xf32> to vector<8x32xf32>
    %119 = arith.addf %117, %118 : vector<8x32xf32>
    %c0_52 = arith.constant 0 : index
    %c0_53 = arith.constant 0 : index
    %120 = vector.load %arg9[%c0_52, %c0_53] : memref<32x128xf32, #tpu.memory_space<vmem>>, vector<32x128xf32>
    %cst_54 = arith.constant dense<0.000000e+00> : vector<8x128xf32>
    %121 = tpu.matmul %119, %120, %cst_54 {dimension_numbers = #tpu.dot_dimension_numbers<[1], [0], [0], [1], [0, 0, 1, 1], [], []>} : vector<8x32xf32>, vector<32x128xf32>, vector<8x128xf32> -> vector<8x128xf32>
    %c0_55 = arith.constant 0 : index
    %c0_56 = arith.constant 0 : index
    %122 = vector.load %arg10[%c0_55, %c0_56] : memref<1x128xf32, #tpu.memory_space<vmem>>, vector<1x128xf32>
    %123 = vector.broadcast %122 : vector<1x128xf32> to vector<8x128xf32>
    %124 = arith.addf %121, %123 : vector<8x128xf32>
    %cst_57 = arith.constant 5.000000e-01 : f32
    %125 = vector.broadcast %cst_57 : f32 to vector<8x128xf32>
    %126 = arith.mulf %125, %124 : vector<8x128xf32>
    %cst_58 = arith.constant 0.707106769 : f32
    %127 = vector.broadcast %cst_58 : f32 to vector<8x128xf32>
    %128 = arith.mulf %124, %127 : vector<8x128xf32>
    %129 = math.erf %128 : vector<8x128xf32>
    %cst_59 = arith.constant 1.000000e+00 : f32
    %130 = vector.broadcast %cst_59 : f32 to vector<8x128xf32>
    %131 = arith.addf %130, %129 : vector<8x128xf32>
    %132 = arith.mulf %126, %131 : vector<8x128xf32>
    %c0_60 = arith.constant 0 : index
    %c0_61 = arith.constant 0 : index
    %133 = vector.load %arg11[%c0_60, %c0_61] : memref<128x32xf32, #tpu.memory_space<vmem>>, vector<128x32xf32>
    %cst_62 = arith.constant dense<0.000000e+00> : vector<8x32xf32>
    %134 = tpu.matmul %132, %133, %cst_62 {dimension_numbers = #tpu.dot_dimension_numbers<[1], [0], [0], [1], [0, 0, 1, 1], [], []>} : vector<8x128xf32>, vector<128x32xf32>, vector<8x32xf32> -> vector<8x32xf32>
    %c0_63 = arith.constant 0 : index
    %c0_64 = arith.constant 0 : index
    %135 = vector.load %arg12[%c0_63, %c0_64] : memref<1x32xf32, #tpu.memory_space<vmem>>, vector<1x32xf32>
    %136 = vector.broadcast %135 : vector<1x32xf32> to vector<8x32xf32>
    %137 = arith.addf %134, %136 : vector<8x32xf32>
    %138 = arith.addf %97, %137 : vector<8x32xf32>
    %c0_65 = arith.constant 0 : index
    %c0_66 = arith.constant 0 : index
    %139 = vector.load %arg13[%c0_65, %c0_66] : memref<8x32xf32, #tpu.memory_space<vmem>>, vector<8x32xf32>
    tpu.vector_store %arg13[%c0_65, %c0_66], %138 {strides = array<i32>} : memref<8x32xf32, #tpu.memory_space<vmem>>, vector<8x32xf32>,
    return
  }
  func.func @transform_0(%arg0: i32) -> (i32, i32) {
    %c0_i32 = arith.constant 0 : i32
    %c0_i32_0 = arith.constant 0 : i32
    return %arg0, %c0_i32 : i32, i32
  }
  func.func @transform_1(%arg0: i32) -> (i32, i32) {
    %c0_i32 = arith.constant 0 : i32
    %c0_i32_0 = arith.constant 0 : i32
    %c0_i32_1 = arith.constant 0 : i32
    return %c0_i32, %c0_i32_0 : i32, i32
  }
  func.func @transform_2(%arg0: i32) -> (i32, i32) {
    %c0_i32 = arith.constant 0 : i32
    %c0_i32_0 = arith.constant 0 : i32
    %c0_i32_1 = arith.constant 0 : i32
    return %c0_i32, %c0_i32_0 : i32, i32
  }
  func.func @transform_3(%arg0: i32) -> (i32, i32) {
    %c0_i32 = arith.constant 0 : i32
    %c0_i32_0 = arith.constant 0 : i32
    %c0_i32_1 = arith.constant 0 : i32
    return %c0_i32, %c0_i32_0 : i32, i32
  }
  func.func @transform_4(%arg0: i32) -> (i32, i32) {
    %c0_i32 = arith.constant 0 : i32
    %c0_i32_0 = arith.constant 0 : i32
    %c0_i32_1 = arith.constant 0 : i32
    return %c0_i32, %c0_i32_0 : i32, i32
  }
  func.func @transform_5(%arg0: i32) -> (i32, i32) {
    %c0_i32 = arith.constant 0 : i32
    %c0_i32_0 = arith.constant 0 : i32
    %c0_i32_1 = arith.constant 0 : i32
    return %c0_i32, %c0_i32_0 : i32, i32
  }
  func.func @transform_6(%arg0: i32) -> (i32, i32) {
    %c0_i32 = arith.constant 0 : i32
    %c0_i32_0 = arith.constant 0 : i32
    %c0_i32_1 = arith.constant 0 : i32
    return %c0_i32, %c0_i32_0 : i32, i32
  }
  func.func @transform_7(%arg0: i32) -> (i32, i32) {
    %c0_i32 = arith.constant 0 : i32
    %c0_i32_0 = arith.constant 0 : i32
    %c0_i32_1 = arith.constant 0 : i32
    return %c0_i32, %c0_i32_0 : i32, i32
  }
  func.func @transform_8(%arg0: i32) -> (i32, i32) {
    %c0_i32 = arith.constant 0 : i32
    %c0_i32_0 = arith.constant 0 : i32
    %c0_i32_1 = arith.constant 0 : i32
    return %c0_i32, %c0_i32_0 : i32, i32
  }
  func.func @transform_9(%arg0: i32) -> (i32, i32) {
    %c0_i32 = arith.constant 0 : i32
    %c0_i32_0 = arith.constant 0 : i32
    %c0_i32_1 = arith.constant 0 : i32
    return %c0_i32, %c0_i32_0 : i32, i32
  }
  func.func @transform_10(%arg0: i32) -> (i32, i32) {
    %c0_i32 = arith.constant 0 : i32
    %c0_i32_0 = arith.constant 0 : i32
    %c0_i32_1 = arith.constant 0 : i32
    return %c0_i32, %c0_i32_0 : i32, i32
  }
  func.func @transform_11(%arg0: i32) -> (i32, i32) {
    %c0_i32 = arith.constant 0 : i32
    %c0_i32_0 = arith.constant 0 : i32
    %c0_i32_1 = arith.constant 0 : i32
    return %c0_i32, %c0_i32_0 : i32, i32
  }
  func.func @transform_12(%arg0: i32) -> (i32, i32) {
    %c0_i32 = arith.constant 0 : i32
    %c0_i32_0 = arith.constant 0 : i32
    return %arg0, %c0_i32 : i32, i32
  }
}

</mosaic_0001>

<bundles_post_ra>
// kernel: tpu_custom_call.1
= control target key start
LH: loop header
LB: loop body
LE: loop exit
PB: predicated region body
PF: predicated region fallthrough
CT: control target
= control target key end

     0   :  { %s1520_s0 = inlined_call_operand.vmem [shape: f32[16,32], index: 0, kind: input, shape index: {}]   ;;  %s1521_s1 = inlined_call_operand.vmem [shape: f32[1,32], index: 1, kind: input, shape index: {}]   ;;  %s1522_s2 = inlined_call_operand.vmem [shape: f32[1,32], index: 2, kind: input, shape index: {}]   ;;  %s1523_s3 = inlined_call_operand.vmem [shape: f32[32,96], index: 3, kind: input, shape index: {}]   ;;  %s1524_s4 = inlined_call_operand.vmem [shape: f32[32,32], index: 4, kind: input, shape index: {}]   ;;  %s1525_s5 = inlined_call_operand.vmem [shape: f32[1,32], index: 5, kind: input, shape index: {}]   ;;  %s1526_s6 = inlined_call_operand.vmem [shape: f32[1,32], index: 6, kind: input, shape index: {}]   ;;  %s1527_s7 = inlined_call_operand.vmem [shape: f32[1,32], index: 7, kind: input, shape index: {}]   ;;  %s1528_s8 = inlined_call_operand.vmem [shape: f32[32,128], index: 8, kind: input, shape index: {}]   ;;  %s1529_s9 = inlined_call_operand.vmem [shape: f32[1,128], index: 9, kind: input, shape index: {}]   ;;  %s1530_s10 = inlined_call_operand.vmem [shape: f32[128,32], index: 10, kind: input, shape index: {}]   ;;  %s1531_s11 = inlined_call_operand.vmem [shape: f32[1,32], index: 11, kind: input, shape index: {}]   ;;  %s1532_s12 = inlined_call_operand.hbm [shape: f32[16,32], index: 12, kind: output, shape index: {}]  }
   0x1   :  { %1533 = sst [smem:[#allocation7_spill]] %s1520_s0 }
   0x2   :  { %1534 = sst [smem:[#allocation8_spill]] %s1521_s1 }
   0x3   :  { %1535 = sst [smem:[#allocation9_spill]] %s1522_s2 }
   0x4   :  { %17 = vsyncpa [#allocation5], 0 }
   0x5   :  { %19 = vsyncpa [#allocation5 + $0x1], 0  ;;  %s1270_s21 = smov 0   ;;  %s1272_s22 = smov 0  }
   0x6   :  { %s1274_s23 = smov 0   ;;  %s1276_s24 = smov 0  }
   0x7 LB: > { %s1291_s25 = sadd.s32 4294967295, %s1188_s24   ;;  %s1015_s26 = sadd.s32 4294967294, %s1188_s24   ;;  %s1188_s24 = sphi %s1276_s24, %s1544_s24   ;;  %s1184_s23 = sphi %s1274_s23, %s1543_s23   ;;  %s1180_s22 = sphi %s1272_s22, %s1542_s22   ;;  %s1176_s21 = sphi %s1270_s21, %s1541_s21  }
   0x8   : > { %s1295_s27 = sadd.s32 1, %s1188_s24   ;;  %s289_s28 = sadd.s32 1, %s1184_s23 }
   0x9   : > { %s286_s29 = ssub.s32 %s1188_s24, %s1295_s27  ;;  %p299_p0 = scmp.ne.s32.totalorder %s1184_s23, %s1180_s22 }
   0xa   : > { %p287_p1 = scmp.eq.s32.totalorder %s286_s29, 0  ;;  %p300_p2 = scmp.eq.s32.totalorder %s1291_s25, 1 }
   0xb   : > { %p305_p3 = scmp.ne.s32.totalorder %s1180_s22, %s1176_s21  ;;  %p306_p4 = scmp.eq.s32.totalorder %s1015_s26, 1 }
   0xc   : > { %s1306_s30 = scalar_select %p287_p1, %s1184_s23, %s289_s28  }
   0xd   : > { %p1308_p5 = por %p300_p2, %p299_p0  ;;  %p1312_p6 = por %p306_p4, %p305_p3 }
   0xe   : > { %p1018_p7 = scmp.ge.s32.totalorder %s1188_s24, 1  ;;  %p364_p8 = scmp.lt.s32.totalorder %s1188_s24, 3 }
  0x10   : > { %p365_p9 = pnand %p1018_p7, %p364_p8 }
  0x11   : > { %p405_p10 = scmp.lt.s32.totalorder (!%p365_p9), %s1291_s25, 1  ;;  %s1538_s0 = sld [smem:[#allocation7_spill]] (!%p365_p9) }
  0x12   : > { %368 = sbr.rel (%p365_p9) target bundleno = 1930 (0x78a), region = 68  ;;  %s1539_s1 = sld [smem:[#allocation8_spill]] (!%p365_p9) }
  0x13   : > { %s1540_s2 = sld [smem:[#allocation9_spill]] (!%p365_p9)  ;;  %s1191_s29 = smov (!%p365_p9), 112  }
  0x14   : > { %s1194_s17 = smov (!%p365_p9), 80   ;;  %s1195_s18 = smov (!%p365_p9), 88  }
  0x15   : > { %s1197_s20 = smov (!%p365_p9), 72   ;;  %s1198_s26 = smov (!%p365_p9), 64  }
  0x16   : > { %s1199_s28 = smov (!%p365_p9), 40  }
  0x17   : > { %s406_s15 = scalar_select %p405_p10, %s1291_s25, 1  ;;  %vm412_vm0 = vcmask 261120   ;;  %v1190_v2 = vmov 32.0   ;;  %v453_v14 = vld [vmem:[%s1523_s3 + $0x18] sm:$0xff]  ;;  %v452_v15 = vld [vmem:[%s1523_s3 + $0x10] sm:$0xff]  ;;  %v451_v16 = vld [vmem:[%s1523_s3 + $0x8] sm:$0xff] }
  0x18   : > { %1102 = vrcp.f32 %v1190_v2  ;;  %469 = vmatpush.msra.mxu2 %v453_v14  ;;  %v450_v17 = vld [vmem:[%s1523_s3] sm:$0xff]  ;;  %vm477_vm5 = vcmask 785408   ;;  %vm483_vm6 = vcmask 64512   ;;  %vm753_vm7 = vcmask 130048  }
  0x19   : > { %s1020_s16 = sshll.u32 %s406_s15, 3  ;;  %v1095_v27 = vld [vmem:[%s1539_s1] ss:$0 sm:$0xff]  ;;  %s1192_s15 = smov 120   ;;  %vm755_vm8 = vcmask 195584  }
  0x1a   : > { %s408_s19 = scalar_lea.vmem %s1538_s0, %s1020_s16  ;;  %470 = vmatpush.msra.mxu2 %v452_v15  ;;  %v1096_v30 = vld [vmem:[%s1540_s2] ss:$0 sm:$0xff]  ;;  %s1193_s16 = smov 96  }
  0x1b   : > { %v1323_v0 = vld [vmem:[%s408_s19] sm:$0xff]  ;;  %s1196_s19 = smov 104  }
  0x1c   : > { %v413_v1 = vsel %vm412_vm0, %v1323_v0, 0.0  ;;  %471 = vmatpush.msra.mxu2 %v451_v16 }
  0x1d   : > { %414 = vadd.xlane.f32.xlu0 %v413_v1 }
  0x1e   : > { %v1103_v3 = vpop.eup %1102  ;;  %472 = vmatpush.msra.mxu2 %v450_v17 }
  0x1f   : > { %v417_v4 = vmul.f32 32.0, %v1103_v3  ;;  %vm421_vm1 = vweird.f32 %v1103_v3 }
  0x21   : > { %v418_v5 = vsub.f32 1.0, %v417_v4 }
  0x23   : > { %v419_v6 = vmul.f32 %v1103_v3, %v418_v5 }
  0x25   : > { %v420_v7 = vadd.f32 %v1103_v3, %v419_v6 }
  0x27   : > { %v1327_v8 = vsel %vm421_vm1, %v1103_v3, %v420_v7 }
  0x90   : > { %v415_v9 = vpop.xlane.xlu0 %414 }
  0x91   : > { %v423_v10 = vmul.f32 %v1327_v8, %v415_v9 }
  0x93   : > { %v424_v11 = vsub.f32 %v1323_v0, %v423_v10 }
  0x95   : > { %v425_v12 = vmul.f32 %v424_v11, %v424_v11 }
  0x97   : > { %v426_v13 = vsel %vm412_vm0, %v425_v12, 0.0 }
  0x98   : > { %427 = vadd.xlane.f32.xlu0 %v426_v13 }
 0x10b   : > { %v428_v18 = vpop.xlane.xlu0 %427 }
 0x10c   : > { %v429_v19 = vmul.f32 %v428_v18, %v1327_v8 }
 0x10e   : > { %v430_v20 = vadd.f32 1e-05, %v429_v19 }
 0x110   : > { %1104 = vrsqrt.f32 %v430_v20  ;;  %vm437_vm3 = vweird.f32 %v430_v20 }
 0x116   : > { %v1105_v21 = vpop.eup %1104 }
 0x117   : > { %v432_v22 = vmul.f32 %v1105_v21, %v430_v20  ;;  %vm438_vm2 = vweird.f32 %v1105_v21 }
 0x118   : > { %vm439_vm4 = vmor %vm437_vm3, %vm438_vm2 }
 0x119   : > { %v433_v23 = vmul.f32 %v1105_v21, %v432_v22 }
 0x11b   : > { %v434_v24 = vmul.f32 0.5, %v433_v23 }
 0x11d   : > { %v435_v25 = vsub.f32 1.5, %v434_v24 }
 0x11f   : > { %v436_v26 = vmul.f32 %v1105_v21, %v435_v25 }
 0x121   : > { %v440_v28 = vsel %vm439_vm4, %v1105_v21, %v436_v26 }
 0x122   : > { %v441_v29 = vmul.f32 %v440_v28, %v424_v11  ;;  %v762_v28 = vld [vmem:[%s1524_s4 + $0x18] sm:$0xff] }
 0x124   : > { %v445_v31 = vmul.f32 %v1095_v27, %v441_v29  ;;  %v761_v29 = vld [vmem:[%s1524_s4 + $0x10] sm:$0xff] }
 0x126   : > { %v449_v32 = vadd.f32 %v1096_v30, %v445_v31  ;;  %v760_v30 = vld [vmem:[%s1524_s4 + $0x8] sm:$0xff]  ;;  %v759_v31 = vld [vmem:[%s1524_s4] sm:$0xff] }
 0x128   : > { %1021 = vmatmul.msk.f32.vlgmr.msra.gmra.mxu2 %vm412_vm0, %v449_v32 }
 0x1ab   : > { %v474_v33 = vpop.f32.mrf.mxu2 }
 0x1ac   : > { %478 = vst.msk [vmem:[#allocation2] sm:$0xff] %vm477_vm5, %v474_v33 }
 0x1b3   : > { %v1352_v34 = vld [vmem:[#allocation2] sm:$0xff] }
 0x1b4   : > { %610 = vrot.lane.b32.xlu0 %v1352_v34, %s1191_s29  ;;  %545 = vrot.lane.b32.xlu2 %v1352_v34, %s1192_s15  ;;  %s1200_s29 = smov 56   ;;  %s1201_s15 = smov 48  }
 0x1b5   : > { %481 = vrot.lane.b32.xlu1 %v1352_v34, %s1193_s16  ;;  %s1202_s16 = smov 8  }
 0x1bc   : > { %612 = vrot.lane.b32.xlu2 %v1352_v34, %s1194_s17  ;;  %s1203_s17 = smov 16  }
 0x1bd   : > { %547 = vrot.lane.b32.xlu1 %v1352_v34, %s1195_s18  ;;  %s1204_s18 = smov 24  }
 0x1c4   : > { %675 = vrot.lane.b32.xlu2 %v1352_v34, %s1196_s19 }
 0x1c5   : > { %677 = vrot.lane.b32.xlu1 %v1352_v34, %s1197_s20 }
 0x20e   : > { %v546_v35 = vpop.permute.xlu2 %545 }
 0x216   : > { %v613_v37 = vpop.permute.xlu2 %612 }
 0x21e   : > { %v676_v41 = vpop.permute.xlu2 %675 }
 0x226   : > { %v611_v39 = vpop.permute.xlu0 %610 }
 0x227   : > { %v482_v36 = vpop.permute.xlu1 %481 }
 0x228   : > { %1022 = vmatpush.xpose.msk.msra.mxu1 %vm483_vm6, %v482_v36 }
 0x22b   : > { %1023 = vmatmul.msk.f32.vlgmr.msra.gmra.mxu1 %vm483_vm6, %v1352_v34 }
 0x22c   : > { %1028 = vmatpush.xpose.msk.msrb.mxu1 %vm483_vm6, %v613_v37 }
 0x22f   : > { %v548_v38 = vpop.permute.xlu1 %547 }
 0x230   : > { %1025 = vmatpush.xpose.msk.msra.mxu3 %vm483_vm6, %v548_v38 }
 0x233   : > { %1026 = vmatmul.msk.f32.vlgmr.msra.gmra.mxu3 %vm483_vm6, %v546_v35  ;;  %1029 = vmatmul.msk.f32.vlgmr.msrb.gmra.mxu1 %vm483_vm6, %v611_v39  ;;  %v1097_v39 = vld [vmem:[%s1525_s5] ss:$0 sm:$0xff] }
 0x237   : > { %v678_v40 = vpop.permute.xlu1 %677 }
 0x238   : > { %1031 = vmatpush.xpose.msk.msra.mxu1 %vm483_vm6, %v678_v40 }
 0x23b   : > { %1032 = vmatmul.msk.f32.vlgmr.msra.gmra.mxu1 %vm483_vm6, %v676_v41 }
 0x23c   : > { %782 = vmatpush.msrb.mxu1 %v762_v28 }
 0x23e   : > { %783 = vmatpush.msrb.mxu1 %v761_v29  ;;  %v900_v29 = vld [vmem:[%s1530_s10 + $0x10] sm:$0xff] }
 0x240   : > { %784 = vmatpush.msrb.mxu1 %v760_v30 }
 0x242   : > { %785 = vmatpush.msrb.mxu1 %v759_v31 }
 0x2a8   : > { %v505_v42 = vpop.f32.mrf.mxu1 }
 0x2a9   : > { %v508_v43 = vsel %vm483_vm6, %v505_v42, -inf }
 0x2aa   : > { %509 = vmax.xlane.f32.xlu1 %v508_v43 }
 0x2b0   : > { %v635_v44 = vpop.f32.mrf.mxu1 }
 0x2b1   : > { %v638_v45 = vsel %vm483_vm6, %v635_v44, -inf }
 0x2b2   : > { %639 = vmax.xlane.f32.xlu0 %v638_v45 }
 0x2b6   : > { %v570_v46 = vpop.f32.mrf.mxu3 }
 0x2b7   : > { %v573_v47 = vsel %vm483_vm6, %v570_v46, -inf }
 0x2b8   : > { %574 = vmax.xlane.f32.xlu2 %v573_v47  ;;  %v700_v48 = vpop.f32.mrf.mxu1 }
 0x2b9   : > { %v703_v49 = vsel %vm483_vm6, %v700_v48, -inf }
 0x2c0   : > { %704 = vmax.xlane.f32.xlu2 %v703_v49  ;;  %v826_v49 = vld [vmem:[%s1528_s8 + $0x18] sm:$0xff] }
 0x2c3   : > { %519 = vrot.lane.b32.xlu1 %v1352_v34, %s1198_s26 }
 0x31d   : > { %v510_v50 = vpop.xlane.xlu1 %509 }
 0x31e   : > { %v511_v51 = vsub.f32 %v505_v42, %v510_v50  ;;  %v824_v50 = vld [vmem:[%s1528_s8 + $0x8] sm:$0xff] }
 0x320   : > { %v512_v52 = vmul.f32 1.442695, %v511_v51  ;;  %v823_v51 = vld [vmem:[%s1528_s8] sm:$0xff] }
 0x322   : > { %1106 = vpow2.f32 %v512_v52 }
 0x325   : > { %v640_v53 = vpop.xlane.xlu0 %639 }
 0x326   : > { %v641_v54 = vsub.f32 %v635_v44, %v640_v53 }
 0x328   : > { %v1107_v55 = vpop.eup %1106  ;;  %v642_v56 = vmul.f32 1.442695, %v641_v54 }
 0x329   : > { %v514_v57 = vsel %vm483_vm6, %v1107_v55, 0.0 }
 0x32a   : > { %1108 = vpow2.f32 %v642_v56  ;;  %515 = vadd.xlane.f32.xlu1 %v514_v57 }
 0x32b   : > { %v575_v58 = vpop.xlane.xlu2 %574 }
 0x32c   : > { %v576_v59 = vsub.f32 %v570_v46, %v575_v58 }
 0x32e   : > { %v577_v60 = vmul.f32 1.442695, %v576_v59 }
 0x330   : > { %v1109_v61 = vpop.eup %1108  ;;  %1110 = vpow2.f32 %v577_v60 }
 0x331   : > { %v644_v62 = vsel %vm483_vm6, %v1109_v61, 0.0 }
 0x332   : > { %645 = vadd.xlane.f32.xlu0 %v644_v62 }
 0x333   : > { %v705_v63 = vpop.xlane.xlu2 %704 }
 0x334   : > { %v706_v1 = vsub.f32 %v700_v48, %v705_v63 }
 0x335   : > { %v520_v2 = vpop.permute.xlu1 %519 }
 0x336   : > { %v1111_v3 = vpop.eup %1110  ;;  %v707_v4 = vmul.f32 1.442695, %v706_v1  ;;  %540 = vmatpush.msrb.mxu2 %v520_v2 }
 0x337   : > { %v579_v5 = vsel %vm483_vm6, %v1111_v3, 0.0 }
 0x338   : > { %1112 = vpow2.f32 %v707_v4  ;;  %580 = vadd.xlane.f32.xlu2 %v579_v5  ;;  %v912_v4 = vld [vmem:[%s1530_s10 + $0x70] sm:$0xff]  ;;  %v911_v5 = vld [vmem:[%s1530_s10 + $0x68] sm:$0xff] }
 0x33e   : > { %v1113_v6 = vpop.eup %1112 }
 0x33f   : > { %v709_v7 = vsel %vm483_vm6, %v1113_v6, 0.0 }
 0x340   : > { %710 = vadd.xlane.f32.xlu2 %v709_v7  ;;  %v910_v7 = vld [vmem:[%s1530_s10 + $0x60] sm:$0xff] }
 0x343   : > { %714 = vrot.lane.b32.xlu1 %v1352_v34, %s1199_s28 }
 0x346   : > { %584 = vrot.lane.b32.xlu0 %v1352_v34, %s1200_s29 }
 0x358   : > { %649 = vrot.lane.b32.xlu2 %v1352_v34, %s1201_s15  ;;  %s402_s15 = sand.u32 1, %s1180_s22  }
 0x39d   : > { %v516_v9 = vpop.xlane.xlu1 %515 }
 0x39e   : > { %1114 = vrcp.f32 %v516_v9  ;;  %v909_v9 = vld [vmem:[%s1530_s10 + $0x58] sm:$0xff] }
 0x3a4   : > { %v1115_v10 = vpop.eup %1114 }
 0x3a5   : > { %v518_v11 = vmul.f32 %v1115_v10, %v1107_v55  ;;  %v646_v13 = vpop.xlane.xlu0 %645  ;;  %v908_v10 = vld [vmem:[%s1530_s10 + $0x50] sm:$0xff] }
 0x3a7   : > { %1024 = vmatmul.msk.f32.vlgmr.msrb.gmra.mxu2 %vm483_vm6, %v518_v11 }
 0x3ab   : > { %v581_v12 = vpop.xlane.xlu2 %580 }
 0x3ac   : > { %1116 = vrcp.f32 %v581_v12 }
 0x3ad   : > { %1118 = vrcp.f32 %v646_v13  ;;  %v907_v13 = vld [vmem:[%s1530_s10 + $0x48] sm:$0xff] }
 0x3b2   : > { %v1117_v15 = vpop.eup %1116 }
 0x3b3   : > { %v711_v14 = vpop.xlane.xlu2 %710  ;;  %v1119_v16 = vpop.eup %1118  ;;  %v583_v17 = vmul.f32 %v1117_v15, %v1111_v3  ;;  %v913_v3 = vld [vmem:[%s1530_s10 + $0x78] sm:$0xff]  ;;  %v906_v15 = vld [vmem:[%s1530_s10 + $0x40] sm:$0xff] }
 0x3b4   : > { %1120 = vrcp.f32 %v711_v14  ;;  %v648_v21 = vmul.f32 %v1119_v16, %v1109_v61  ;;  %v1098_v61 = vld [vmem:[%s1526_s6] ss:$0 sm:$0xff]  ;;  %918 = vmatpush.msra.mxu0 %v913_v3 }
 0x3b5   : > { %v715_v19 = vpop.permute.xlu1 %714 }
 0x3b6   : > { %919 = vmatpush.msra.mxu0 %v912_v4 }
 0x3b8   : > { %v585_v18 = vpop.permute.xlu0 %584  ;;  %920 = vmatpush.msra.mxu0 %v911_v5 }
 0x3b9   : > { %605 = vmatpush.msra.mxu2 %v585_v18 }
 0x3ba   : > { %1027 = vmatmul.msk.f32.vlgmr.msra.gmra.mxu2 %vm483_vm6, %v583_v17  ;;  %v1121_v22 = vpop.eup %1120  ;;  %921 = vmatpush.msra.mxu0 %v910_v7  ;;  %v905_v17 = vld [vmem:[%s1530_s10 + $0x38] sm:$0xff] }
 0x3bb   : > { %735 = vmatpush.msrb.mxu2 %v715_v19  ;;  %v650_v20 = vpop.permute.xlu2 %649  ;;  %v713_v23 = vmul.f32 %v1121_v22, %v1113_v6  ;;  %v1100_v6 = vld [vmem:[%s1529_s9] ss:$0 sm:$0xff]  ;;  %v904_v19 = vld [vmem:[%s1530_s10 + $0x30] sm:$0xff] }
 0x3bc   : > { %670 = vmatpush.msrb.mxu3 %v650_v20  ;;  %922 = vmatpush.msra.mxu0 %v909_v9 }
 0x3bd   : > { %1030 = vmatmul.msk.f32.vlgmr.msrb.gmra.mxu3 %vm483_vm6, %v648_v21  ;;  %v903_v21 = vld [vmem:[%s1530_s10 + $0x28] sm:$0xff] }
 0x3be   : > { %846 = vmatpush.msra.mxu3 %v826_v49  ;;  %923 = vmatpush.msra.mxu0 %v908_v10 }
 0x3c0   : > { %924 = vmatpush.msra.mxu0 %v907_v13 }
 0x3c2   : > { %1033 = vmatmul.msk.f32.vlgmr.msrb.gmra.mxu2 %vm483_vm6, %v713_v23  ;;  %925 = vmatpush.msra.mxu0 %v906_v15 }
 0x3c4   : > { %926 = vmatpush.msra.mxu0 %v905_v17 }
 0x3c6   : > { %927 = vmatpush.msra.mxu0 %v904_v19 }
 0x3c8   : > { %928 = vmatpush.msra.mxu0 %v903_v21 }
 0x42a   : > { %v542_v24 = vpop.f32.mrf.mxu2 }
 0x43d   : > { %v607_v25 = vpop.f32.mrf.mxu2 }
 0x43e   : > { %741 = vrot.lane.b32.xlu0 %v607_v25, %s1202_s16  ;;  %s1019_s16 = sshll.u32 %s402_s15, 3 }
 0x43f   : > { %s404_s28 = scalar_lea.vmem [#allocation4], %s1019_s16  ;;  %s1146_s16 = scalar_lea.hbm %s1532_s12, 16 }
 0x440   : > { %v672_v26 = vpop.f32.mrf.mxu3  ;;  %s953_s29 = sshll.u32 %s404_s28, 4  ;;  %s954_s29 = int_to_ptr.vmem [resolvable:$true] %s953_s29 }
 0x441   : > { %745 = vrot.lane.b32.xlu1 %v672_v26, %s1203_s17  ;;  %s1038_s17 = sshll.u32 %s1291_s25, 3  ;;  %s941_s25 = scalar_lea.sflag [#allocation5], %s402_s15 }
 0x442   : > { %s951_s26 = scalar_lea.hbm %s1532_s12, %s1038_s17 }
 0x443   : > { %s955_s1 = sshll.u32 %s951_s26, 4  ;;  %s956_s1 = int_to_ptr.hbm [resolvable:$true] %s955_s1 }
 0x444   : > { %s1140_s2 = sshra.s32 %s956_s1, 4  ;;  %s1141_s2 = int_to_ptr.hbm [resolvable:$true] %s1140_s2 }
 0x445   : > { %v737_v27 = vpop.f32.mrf.mxu2  ;;  %p1147_p0 = scmp.lt.s32.totalorder %s1141_s2, %s1532_s12 }
 0x446   : > { %749 = vrot.lane.b32.xlu2 %v737_v27, %s1204_s18  ;;  %v901_v27 = vld [vmem:[%s1530_s10 + $0x18] sm:$0xff]  ;;  %s1142_s18 = scalar_lea.hbm %s1141_s2, 8 }
 0x447   : > { %p1143_p11 = scmp.ne.s32.totalorder %s1141_s2, %s1142_s18  ;;  %p1148_p1 = scmp.lt.s32.totalorder %s1146_s16, %s1142_s18 }
 0x449   : > { %p1144_p12 = pnand %p1143_p11, %p1308_p5  ;;  %p1149_p2 = por %p1148_p1, %p1147_p0 }
 0x44b   : > { %p1145_p13 = pneg %p1144_p12 }
 0x44d   : > { %p1150_p3 = pnand %p1149_p2, %p1145_p13 }
 0x4a0   : > { %v750_v35 = vpop.permute.xlu2 %749 }
 0x4b0   : > { %v742_v32 = vpop.permute.xlu0 %741 }
 0x4b1   : > { %v752_v33 = vsel %vm483_vm6, %v542_v24, %v742_v32  ;;  %v902_v24 = vld [vmem:[%s1530_s10 + $0x20] sm:$0xff]  ;;  %v899_v32 = vld [vmem:[%s1530_s10 + $0x8] sm:$0xff] }
 0x4b2   : > { %929 = vmatpush.msra.mxu0 %v902_v24 }
 0x4b3   : > { %v746_v34 = vpop.permute.xlu1 %745 }
 0x4b4   : > { %v754_v36 = vsel %vm753_vm7, %v752_v33, %v746_v34  ;;  %930 = vmatpush.msra.mxu0 %v901_v27  ;;  %v898_v34 = vld [vmem:[%s1530_s10] sm:$0xff] }
 0x4b5   : > { %v756_v37 = vsel %vm755_vm8, %v754_v36, %v750_v35 }
 0x4b6   : > { %757 = vst.msk [vmem:[#allocation3] sm:$0xff] %vm412_vm0, %v756_v37  ;;  %931 = vmatpush.msra.mxu0 %v900_v29 }
 0x4b8   : > { %932 = vmatpush.msra.mxu0 %v899_v32 }
 0x4ba   : > { %933 = vmatpush.msra.mxu0 %v898_v34 }
 0x4bd   : > { %v758_v38 = vld [vmem:[#allocation3] sm:$0xff] }
 0x4be   : > { %1034 = vmatmul.msk.f32.vlgmr.msrb.gmra.mxu1 %vm412_vm0, %v758_v38 }
 0x53b   : > { %v787_v40 = vpop.f32.mrf.mxu1 }
 0x53c   : > { %v788_v41 = vadd.f32 %v1097_v39, %v787_v40 }
 0x53e   : > { %v1405_v42 = vadd.f32 %v788_v41, %v1323_v0  ;;  %v825_v0 = vld [vmem:[%s1528_s8 + $0x10] sm:$0xff] }
 0x53f   : > { %847 = vmatpush.msra.mxu3 %v825_v0 }
 0x540   : > { %v793_v43 = vsel %vm412_vm0, %v1405_v42, 0.0 }
 0x541   : > { %794 = vadd.xlane.f32.xlu0 %v793_v43  ;;  %848 = vmatpush.msra.mxu3 %v824_v50 }
 0x543   : > { %849 = vmatpush.msra.mxu3 %v823_v51 }
 0x5b4   : > { %v795_v44 = vpop.xlane.xlu0 %794 }
 0x5b5   : > { %v796_v45 = vmul.f32 %v795_v44, %v1327_v8 }
 0x5b7   : > { %v797_v46 = vsub.f32 %v1405_v42, %v796_v45 }
 0x5b9   : > { %v798_v47 = vmul.f32 %v797_v46, %v797_v46 }
 0x5bb   : > { %v799_v48 = vsel %vm412_vm0, %v798_v47, 0.0 }
 0x5bc   : > { %800 = vadd.xlane.f32.xlu1 %v799_v48 }
 0x62f   : > { %v801_v52 = vpop.xlane.xlu1 %800 }
 0x630   : > { %v802_v53 = vmul.f32 %v801_v52, %v1327_v8  ;;  %v1099_v8 = vld [vmem:[%s1527_s7] ss:$0 sm:$0xff] }
 0x632   : > { %v803_v54 = vadd.f32 1e-05, %v802_v53 }
 0x634   : > { %1122 = vrsqrt.f32 %v803_v54  ;;  %vm810_vm10 = vweird.f32 %v803_v54 }
 0x63a   : > { %v1123_v55 = vpop.eup %1122 }
 0x63b   : > { %v805_v56 = vmul.f32 %v1123_v55, %v803_v54  ;;  %vm811_vm9 = vweird.f32 %v1123_v55 }
 0x63c   : > { %vm812_vm11 = vmor %vm810_vm10, %vm811_vm9 }
 0x63d   : > { %v806_v57 = vmul.f32 %v1123_v55, %v805_v56 }
 0x63f   : > { %v807_v58 = vmul.f32 0.5, %v806_v57 }
 0x641   : > { %v808_v59 = vsub.f32 1.5, %v807_v58 }
 0x643   : > { %v809_v60 = vmul.f32 %v1123_v55, %v808_v59 }
 0x645   : > { %v813_v62 = vsel %vm812_vm11, %v1123_v55, %v809_v60 }
 0x646   : > { %v814_v63 = vmul.f32 %v813_v62, %v797_v46  ;;  %v1101_v62 = vld [vmem:[%s1531_s11] ss:$0 sm:$0xff] }
 0x648   : > { %v818_v1 = vmul.f32 %v1098_v61, %v814_v63 }
 0x64a   : > { %v822_v2 = vadd.f32 %v1099_v8, %v818_v1 }
 0x64c   : > { %1035 = vmatmul.msk.f32.vlgmr.msra.gmra.mxu3 %vm412_vm0, %v822_v2 }
 0x6cf   : > { %v851_v11 = vpop.f32.mrf.mxu3 }
 0x6d0   : > { %v852_v12 = vadd.f32 %v1100_v6, %v851_v11 }
 0x6d2   : > { %v855_v14 = vmul.f32 0.70710677, %v852_v12  ;;  %v854_v59 = vmul.f32 0.5, %v852_v12 }
 0x6d4   : > { %v856_v16 = vmul.f32 %v855_v14, %v855_v14 }
 0x6d6   : > { %v857_v18 = vmin.f32 %v856_v16, 16.0 }
 0x6d8   : > { %v858_v20 = vmul.f32 2.1237322e-06, %v857_v18  ;;  %v869_v22 = vmul.f32 3.8918573e-05, %v857_v18 }
 0x6da   : > { %v859_v23 = vadd.f32 0.00028619796, %v858_v20  ;;  %v870_v25 = vadd.f32 0.001143296, %v869_v22 }
 0x6dc   : > { %v860_v26 = vmul.f32 %v859_v23, %v857_v18  ;;  %v871_v28 = vmul.f32 %v870_v25, %v857_v18 }
 0x6de   : > { %v872_v30 = vadd.f32 0.014752088, %v871_v28  ;;  %v861_v31 = vadd.f32 0.0036580483, %v860_v26 }
 0x6e0   : > { %v873_v33 = vmul.f32 %v872_v30, %v857_v18  ;;  %v862_v36 = vmul.f32 %v861_v31, %v857_v18 }
 0x6e2   : > { %v874_v35 = vadd.f32 0.112945676, %v873_v33  ;;  %v863_v39 = vadd.f32 0.05243302, %v862_v36 }
 0x6e4   : > { %v875_v37 = vmul.f32 %v874_v35, %v857_v18  ;;  %v864_v43 = vmul.f32 %v863_v39, %v857_v18 }
 0x6e6   : > { %v876_v38 = vadd.f32 0.4994258, %v875_v37  ;;  %v865_v44 = vadd.f32 0.18741608, %v864_v43 }
 0x6e8   : > { %v877_v40 = vmul.f32 %v876_v38, %v857_v18  ;;  %v866_v46 = vmul.f32 %v865_v44, %v857_v18 }
 0x6ea   : > { %v878_v41 = vadd.f32 1.0, %v877_v40  ;;  %v867_v0 = vadd.f32 1.1283791, %v866_v46 }
 0x6ec   : > { %1124 = vrcp.f32 %v878_v41  ;;  %v890_v49 = vand.u32 2147483648, %v878_v41  ;;  %v888_v51 = vand.u32 2147483647, %v878_v41  ;;  %vm884_vm13 = vweird.f32 %v878_v41 }
 0x6ed   : > { %v868_v54 = vmul.f32 %v867_v0, %v855_v14 }
 0x6ee   : > { %v891_v53 = vor.u32 1.1754944e-38, %v890_v49  ;;  %vm889_vm15 = vcmp.eq.f32.partialorder %v888_v51, 8.507059e+37 }
 0x6f2   : > { %v1125_v45 = vpop.eup %1124 }
 0x6f3   : > { %v880_v47 = vmul.f32 %v1125_v45, %v878_v41  ;;  %vm885_vm12 = vweird.f32 %v1125_v45 }
 0x6f4   : > { %vm886_vm14 = vmor %vm884_vm13, %vm885_vm12 }
 0x6f5   : > { %v881_v48 = vsub.f32 1.0, %v880_v47 }
 0x6f7   : > { %v882_v50 = vmul.f32 %v1125_v45, %v881_v48 }
 0x6f9   : > { %v883_v52 = vadd.f32 %v1125_v45, %v882_v50 }
 0x6fb   : > { %v887_v55 = vsel %vm886_vm14, %v1125_v45, %v883_v52 }
 0x6fc   : > { %v892_v56 = vsel %vm889_vm15, %v891_v53, %v887_v55 }
 0x6fd   : > { %v893_v57 = vmul.f32 %v892_v56, %v868_v54 }
 0x6ff   : > { %v1036_v58 = vclamps-f32 %v893_v57, 1.0 }
 0x701   : > { %v896_v60 = vadd.f32 1.0, %v1036_v58 }
 0x703   : > { %v897_v61 = vmul.f32 %v896_v60, %v854_v59 }
 0x705   : > { %934 = vmatmul.f32.vlgmr.msra.gmra.mxu0 %v897_v61 }
 0x782   : > { %v935_v63 = vpop.f32.mrf.mxu0 }
 0x783   : > { %v936_v8 = vadd.f32 %v1101_v62, %v935_v63 }
 0x785   : > { %v938_v1 = vadd.f32 %v936_v8, %v1405_v42 }
 0x787   : > { %939 = vst.msk [vmem:[%s404_s28] sm:$0xff] %vm412_vm0, %v938_v1 }
 0x788   : > { %1153 = shalt.err (!%p1150_p3)
}
 0x789   : > { %1041 = dma.vmem_to_hbm [thread:$0]  (%p1308_p5), %s954_s29, 128, %s956_s1, %s941_s25  }
 0x78a PF: > { %p1047_p4 = scmp.ge.s32.totalorder %s1188_s24, 2  ;;  %s967_s15 = sand.u32 1, %s1176_s21  }
 0x78b   : > { %s968_s26 = scalar_lea.sflag [#allocation5], %s967_s15 }
 0x78c   : > { %p1044_p7 = pnand %p1047_p4, %p1312_p6 }
 0x78e   : > { %p1045_p8 = pneg %p1044_p7 }
 0x790   : > { %1171 = dma.done.wait (%p1045_p8), %s968_s26, 128  }
 0x791   : > { %1173 = vsyncadd (%p1045_p8), %s968_s26, 4294967168  ;;  %p22_p9 = scmp.ge.s32.totalorder %s1295_s27, 4   ;;  %s1541_s21 = smov %s1180_s22 }
 0x792   : > { %s1542_s22 = smov %s1184_s23  ;;  %s1543_s23 = smov %s1306_s30 }
 0x793   : > { %s1544_s24 = smov %s1295_s27  ;;  %24 = sbr.rel (!%p22_p9) target bundleno = 7 (0x7), region = 103 }
 0x798   :  { %974 = vsyncpa [#allocation5], 1 }
 0x799   :  { %976 = vsyncpa [#allocation5 + $0x1], 1 }

// kernel: tpu_custom_call.1
= control target key start
LH: loop header
LB: loop body
LE: loop exit
PB: predicated region body
PF: predicated region fallthrough
CT: control target
= control target key end

     0   :  { %s1520_s0 = inlined_call_operand.vmem [shape: f32[16,32], index: 0, kind: input, shape index: {}]   ;;  %s1521_s1 = inlined_call_operand.vmem [shape: f32[1,32], index: 1, kind: input, shape index: {}]   ;;  %s1522_s2 = inlined_call_operand.vmem [shape: f32[1,32], index: 2, kind: input, shape index: {}]   ;;  %s1523_s3 = inlined_call_operand.vmem [shape: f32[32,96], index: 3, kind: input, shape index: {}]   ;;  %s1524_s4 = inlined_call_operand.vmem [shape: f32[32,32], index: 4, kind: input, shape index: {}]   ;;  %s1525_s5 = inlined_call_operand.vmem [shape: f32[1,32], index: 5, kind: input, shape index: {}]   ;;  %s1526_s6 = inlined_call_operand.vmem [shape: f32[1,32], index: 6, kind: input, shape index: {}]   ;;  %s1527_s7 = inlined_call_operand.vmem [shape: f32[1,32], index: 7, kind: input, shape index: {}]   ;;  %s1528_s8 = inlined_call_operand.vmem [shape: f32[32,128], index: 8, kind: input, shape index: {}]   ;;  %s1529_s9 = inlined_call_operand.vmem [shape: f32[1,128], index: 9, kind: input, shape index: {}]   ;;  %s1530_s10 = inlined_call_operand.vmem [shape: f32[128,32], index: 10, kind: input, shape index: {}]   ;;  %s1531_s11 = inlined_call_operand.vmem [shape: f32[1,32], index: 11, kind: input, shape index: {}]   ;;  %s1532_s12 = inlined_call_operand.hbm [shape: f32[16,32], index: 12, kind: output, shape index: {}]  }
   0x1   :  { %1533 = sst [smem:[#allocation7_spill]] %s1520_s0 }
   0x2   :  { %1534 = sst [smem:[#allocation8_spill]] %s1521_s1 }
   0x3   :  { %1535 = sst [smem:[#allocation9_spill]] %s1522_s2 }
   0x4   :  { %17 = vsyncpa [#allocation5], 0 }
   0x5   :  { %19 = vsyncpa [#allocation5 + $0x1], 0  ;;  %s1270_s21 = smov 0   ;;  %s1272_s22 = smov 0  }
   0x6   :  { %s1274_s23 = smov 0   ;;  %s1276_s24 = smov 0  }
   0x7 LB: > { %s1291_s25 = sadd.s32 4294967295, %s1188_s24   ;;  %s1015_s26 = sadd.s32 4294967294, %s1188_s24   ;;  %s1188_s24 = sphi %s1276_s24, %s1544_s24   ;;  %s1184_s23 = sphi %s1274_s23, %s1543_s23   ;;  %s1180_s22 = sphi %s1272_s22, %s1542_s22   ;;  %s1176_s21 = sphi %s1270_s21, %s1541_s21  }
   0x8   : > { %s1295_s27 = sadd.s32 1, %s1188_s24   ;;  %s289_s28 = sadd.s32 1, %s1184_s23 }
   0x9   : > { %s286_s29 = ssub.s32 %s1188_s24, %s1295_s27  ;;  %p299_p0 = scmp.ne.s32.totalorder %s1184_s23, %s1180_s22 }
   0xa   : > { %p287_p1 = scmp.eq.s32.totalorder %s286_s29, 0  ;;  %p300_p2 = scmp.eq.s32.totalorder %s1291_s25, 1 }
   0xb   : > { %p305_p3 = scmp.ne.s32.totalorder %s1180_s22, %s1176_s21  ;;  %p306_p4 = scmp.eq.s32.totalorder %s1015_s26, 1 }
   0xc   : > { %s1306_s30 = scalar_select %p287_p1, %s1184_s23, %s289_s28  }
   0xd   : > { %p1308_p5 = por %p300_p2, %p299_p0  ;;  %p1312_p6 = por %p306_p4, %p305_p3 }
   0xe   : > { %p1018_p7 = scmp.ge.s32.totalorder %s1188_s24, 1  ;;  %p364_p8 = scmp.lt.s32.totalorder %s1188_s24, 3 }
  0x10   : > { %p365_p9 = pnand %p1018_p7, %p364_p8 }
  0x11   : > { %p405_p10 = scmp.lt.s32.totalorder (!%p365_p9), %s1291_s25, 1  ;;  %s1538_s0 = sld [smem:[#allocation7_spill]] (!%p365_p9) }
  0x12   : > { %368 = sbr.rel (%p365_p9) target bundleno = 1930 (0x78a), region = 68  ;;  %s1539_s1 = sld [smem:[#allocation8_spill]] (!%p365_p9) }
  0x13   : > { %s1540_s2 = sld [smem:[#allocation9_spill]] (!%p365_p9)  ;;  %s1191_s29 = smov (!%p365_p9), 112  }
  0x14   : > { %s1194_s17 = smov (!%p365_p9), 80   ;;  %s1195_s18 = smov (!%p365_p9), 88  }
  0x15   : > { %s1197_s20 = smov (!%p365_p9), 72   ;;  %s1198_s26 = smov (!%p365_p9), 64  }
  0x16   : > { %s1199_s28 = smov (!%p365_p9), 40  }
  0x17   : > { %s406_s15 = scalar_select %p405_p10, %s1291_s25, 1  ;;  %vm412_vm0 = vcmask 261120   ;;  %v1190_v2 = vmov 32.0   ;;  %v453_v14 = vld [vmem:[%s1523_s3 + $0x18] sm:$0xff]  ;;  %v452_v15 = vld [vmem:[%s1523_s3 + $0x10] sm:$0xff]  ;;  %v451_v16 = vld [vmem:[%s1523_s3 + $0x8] sm:$0xff] }
  0x18   : > { %1102 = vrcp.f32 %v1190_v2  ;;  %469 = vmatpush.msra.mxu2 %v453_v14  ;;  %v450_v17 = vld [vmem:[%s1523_s3] sm:$0xff]  ;;  %vm477_vm5 = vcmask 785408   ;;  %vm483_vm6 = vcmask 64512   ;;  %vm753_vm7 = vcmask 130048  }
  0x19   : > { %s1020_s16 = sshll.u32 %s406_s15, 3  ;;  %v1095_v27 = vld [vmem:[%s1539_s1] ss:$0 sm:$0xff]  ;;  %s1192_s15 = smov 120   ;;  %vm755_vm8 = vcmask 195584  }
  0x1a   : > { %s408_s19 = scalar_lea.vmem %s1538_s0, %s1020_s16  ;;  %470 = vmatpush.msra.mxu2 %v452_v15  ;;  %v1096_v30 = vld [vmem:[%s1540_s2] ss:$0 sm:$0xff]  ;;  %s1193_s16 = smov 96  }
  0x1b   : > { %v1323_v0 = vld [vmem:[%s408_s19] sm:$0xff]  ;;  %s1196_s19 = smov 104  }
  0x1c   : > { %v413_v1 = vsel %vm412_vm0, %v1323_v0, 0.0  ;;  %471 = vmatpush.msra.mxu2 %v451_v16 }
  0x1d   : > { %414 = vadd.xlane.f32.xlu0 %v413_v1 }
  0x1e   : > { %v1103_v3 = vpop.eup %1102  ;;  %472 = vmatpush.msra.mxu2 %v450_v17 }
  0x1f   : > { %v417_v4 = vmul.f32 32.0, %v1103_v3  ;;  %vm421_vm1 = vweird.f32 %v1103_v3 }
  0x21   : > { %v418_v5 = vsub.f32 1.0, %v417_v4 }
  0x23   : > { %v419_v6 = vmul.f32 %v1103_v3, %v418_v5 }
  0x25   : > { %v420_v7 = vadd.f32 %v1103_v3, %v419_v6 }
  0x27   : > { %v1327_v8 = vsel %vm421_vm1, %v1103_v3, %v420_v7 }
  0x90   : > { %v415_v9 = vpop.xlane.xlu0 %414 }
  0x91   : > { %v423_v10 = vmul.f32 %v1327_v8, %v415_v9 }
  0x93   : > { %v424_v11 = vsub.f32 %v1323_v0, %v423_v10 }
  0x95   : > { %v425_v12 = vmul.f32 %v424_v11, %v424_v11 }
  0x97   : > { %v426_v13 = vsel %vm412_vm0, %v425_v12, 0.0 }
  0x98   : > { %427 = vadd.xlane.f32.xlu0 %v426_v13 }
 0x10b   : > { %v428_v18 = vpop.xlane.xlu0 %427 }
 0x10c   : > { %v429_v19 = vmul.f32 %v428_v18, %v1327_v8 }
 0x10e   : > { %v430_v20 = vadd.f32 1e-05, %v429_v19 }
 0x110   : > { %1104 = vrsqrt.f32 %v430_v20  ;;  %vm437_vm3 = vweird.f32 %v430_v20 }
 0x116   : > { %v1105_v21 = vpop.eup %1104 }
 0x117   : > { %v432_v22 = vmul.f32 %v1105_v21, %v430_v20  ;;  %vm438_vm2 = vweird.f32 %v1105_v21 }
 0x118   : > { %vm439_vm4 = vmor %vm437_vm3, %vm438_vm2 }
 0x119   : > { %v433_v23 = vmul.f32 %v1105_v21, %v432_v22 }
 0x11b   : > { %v434_v24 = vmul.f32 0.5, %v433_v23 }
 0x11d   : > { %v435_v25 = vsub.f32 1.5, %v434_v24 }
 0x11f   : > { %v436_v26 = vmul.f32 %v1105_v21, %v435_v25 }
 0x121   : > { %v440_v28 = vsel %vm439_vm4, %v1105_v21, %v436_v26 }
 0x122   : > { %v441_v29 = vmul.f32 %v440_v28, %v424_v11  ;;  %v762_v28 = vld [vmem:[%s1524_s4 + $0x18] sm:$0xff] }
 0x124   : > { %v445_v31 = vmul.f32 %v1095_v27, %v441_v29  ;;  %v761_v29 = vld [vmem:[%s1524_s4 + $0x10] sm:$0xff] }
 0x126   : > { %v449_v32 = vadd.f32 %v1096_v30, %v445_v31  ;;  %v760_v30 = vld [vmem:[%s1524_s4 + $0x8] sm:$0xff]  ;;  %v759_v31 = vld [vmem:[%s1524_s4] sm:$0xff] }
 0x128   : > { %1021 = vmatmul.msk.f32.vlgmr.msra.gmra.mxu2 %vm412_vm0, %v449_v32 }
 0x1ab   : > { %v474_v33 = vpop.f32.mrf.mxu2 }
 0x1ac   : > { %478 = vst.msk [vmem:[#allocation2] sm:$0xff] %vm477_vm5, %v474_v33 }
 0x1b3   : > { %v1352_v34 = vld [vmem:[#allocation2] sm:$0xff] }
 0x1b4   : > { %610 = vrot.lane.b32.xlu0 %v1352_v34, %s1191_s29  ;;  %545 = vrot.lane.b32.xlu2 %v1352_v34, %s1192_s15  ;;  %s1200_s29 = smov 56   ;;  %s1201_s15 = smov 48  }
 0x1b5   : > { %481 = vrot.lane.b32.xlu1 %v1352_v34, %s1193_s16  ;;  %s1202_s16 = smov 8  }
 0x1bc   : > { %612 = vrot.lane.b32.xlu2 %v1352_v34, %s1194_s17  ;;  %s1203_s17 = smov 16  }
 0x1bd   : > { %547 = vrot.lane.b32.xlu1 %v1352_v34, %s1195_s18  ;;  %s1204_s18 = smov 24  }
 0x1c4   : > { %675 = vrot.lane.b32.xlu2 %v1352_v34, %s1196_s19 }
 0x1c5   : > { %677 = vrot.lane.b32.xlu1 %v1352_v34, %s1197_s20 }
 0x20e   : > { %v546_v35 = vpop.permute.xlu2 %545 }
 0x216   : > { %v613_v37 = vpop.permute.xlu2 %612 }
 0x21e   : > { %v676_v41 = vpop.permute.xlu2 %675 }
 0x226   : > { %v611_v39 = vpop.permute.xlu0 %610 }
 0x227   : > { %v482_v36 = vpop.permute.xlu1 %481 }
 0x228   : > { %1022 = vmatpush.xpose.msk.msra.mxu1 %vm483_vm6, %v482_v36 }
 0x22b   : > { %1023 = vmatmul.msk.f32.vlgmr.msra.gmra.mxu1 %vm483_vm6, %v1352_v34 }
 0x22c   : > { %1028 = vmatpush.xpose.msk.msrb.mxu1 %vm483_vm6, %v613_v37 }
 0x22f   : > { %v548_v38 = vpop.permute.xlu1 %547 }
 0x230   : > { %1025 = vmatpush.xpose.msk.msra.mxu3 %vm483_vm6, %v548_v38 }
 0x233   : > { %1026 = vmatmul.msk.f32.vlgmr.msra.gmra.mxu3 %vm483_vm6, %v546_v35  ;;  %1029 = vmatmul.msk.f32.vlgmr.msrb.gmra.mxu1 %vm483_vm6, %v611_v39  ;;  %v1097_v39 = vld [vmem:[%s1525_s5] ss:$0 sm:$0xff] }
 0x237   : > { %v678_v40 = vpop.permute.xlu1 %677 }
 0x238   : > { %1031 = vmatpush.xpose.msk.msra.mxu1 %vm483_vm6, %v678_v40 }
 0x23b   : > { %1032 = vmatmul.msk.f32.vlgmr.msra.gmra.mxu1 %vm483_vm6, %v676_v41 }
 0x23c   : > { %782 = vmatpush.msrb.mxu1 %v762_v28 }
 0x23e   : > { %783 = vmatpush.msrb.mxu1 %v761_v29  ;;  %v900_v29 = vld [vmem:[%s1530_s10 + $0x10] sm:$0xff] }
 0x240   : > { %784 = vmatpush.msrb.mxu1 %v760_v30 }
 0x242   : > { %785 = vmatpush.msrb.mxu1 %v759_v31 }
 0x2a8   : > { %v505_v42 = vpop.f32.mrf.mxu1 }
 0x2a9   : > { %v508_v43 = vsel %vm483_vm6, %v505_v42, -inf }
 0x2aa   : > { %509 = vmax.xlane.f32.xlu1 %v508_v43 }
 0x2b0   : > { %v635_v44 = vpop.f32.mrf.mxu1 }
 0x2b1   : > { %v638_v45 = vsel %vm483_vm6, %v635_v44, -inf }
 0x2b2   : > { %639 = vmax.xlane.f32.xlu0 %v638_v45 }
 0x2b6   : > { %v570_v46 = vpop.f32.mrf.mxu3 }
 0x2b7   : > { %v573_v47 = vsel %vm483_vm6, %v570_v46, -inf }
 0x2b8   : > { %574 = vmax.xlane.f32.xlu2 %v573_v47  ;;  %v700_v48 = vpop.f32.mrf.mxu1 }
 0x2b9   : > { %v703_v49 = vsel %vm483_vm6, %v700_v48, -inf }
 0x2c0   : > { %704 = vmax.xlane.f32.xlu2 %v703_v49  ;;  %v826_v49 = vld [vmem:[%s1528_s8 + $0x18] sm:$0xff] }
 0x2c3   : > { %519 = vrot.lane.b32.xlu1 %v1352_v34, %s1198_s26 }
 0x31d   : > { %v510_v50 = vpop.xlane.xlu1 %509 }
 0x31e   : > { %v511_v51 = vsub.f32 %v505_v42, %v510_v50  ;;  %v824_v50 = vld [vmem:[%s1528_s8 + $0x8] sm:$0xff] }
 0x320   : > { %v512_v52 = vmul.f32 1.442695, %v511_v51  ;;  %v823_v51 = vld [vmem:[%s1528_s8] sm:$0xff] }
 0x322   : > { %1106 = vpow2.f32 %v512_v52 }
 0x325   : > { %v640_v53 = vpop.xlane.xlu0 %639 }
 0x326   : > { %v641_v54 = vsub.f32 %v635_v44, %v640_v53 }
 0x328   : > { %v1107_v55 = vpop.eup %1106  ;;  %v642_v56 = vmul.f32 1.442695, %v641_v54 }
 0x329   : > { %v514_v57 = vsel %vm483_vm6, %v1107_v55, 0.0 }
 0x32a   : > { %1108 = vpow2.f32 %v642_v56  ;;  %515 = vadd.xlane.f32.xlu1 %v514_v57 }
 0x32b   : > { %v575_v58 = vpop.xlane.xlu2 %574 }
 0x32c   : > { %v576_v59 = vsub.f32 %v570_v46, %v575_v58 }
 0x32e   : > { %v577_v60 = vmul.f32 1.442695, %v576_v59 }
 0x330   : > { %v1109_v61 = vpop.eup %1108  ;;  %1110 = vpow2.f32 %v577_v60 }
 0x331   : > { %v644_v62 = vsel %vm483_vm6, %v1109_v61, 0.0 }
 0x332   : > { %645 = vadd.xlane.f32.xlu0 %v644_v62 }
 0x333   : > { %v705_v63 = vpop.xlane.xlu2 %704 }
 0x334   : > { %v706_v1 = vsub.f32 %v700_v48, %v705_v63 }
 0x335   : > { %v520_v2 = vpop.permute.xlu1 %519 }
 0x336   : > { %v1111_v3 = vpop.eup %1110  ;;  %v707_v4 = vmul.f32 1.442695, %v706_v1  ;;  %540 = vmatpush.msrb.mxu2 %v520_v2 }
 0x337   : > { %v579_v5 = vsel %vm483_vm6, %v1111_v3, 0.0 }
 0x338   : > { %1112 = vpow2.f32 %v707_v4  ;;  %580 = vadd.xlane.f32.xlu2 %v579_v5  ;;  %v912_v4 = vld [vmem:[%s1530_s10 + $0x70] sm:$0xff]  ;;  %v911_v5 = vld [vmem:[%s1530_s10 + $0x68] sm:$0xff] }
 0x33e   : > { %v1113_v6 = vpop.eup %1112 }
 0x33f   : > { %v709_v7 = vsel %vm483_vm6, %v1113_v6, 0.0 }
 0x340   : > { %710 = vadd.xlane.f32.xlu2 %v709_v7  ;;  %v910_v7 = vld [vmem:[%s1530_s10 + $0x60] sm:$0xff] }
 0x343   : > { %714 = vrot.lane.b32.xlu1 %v1352_v34, %s1199_s28 }
 0x346   : > { %584 = vrot.lane.b32.xlu0 %v1352_v34, %s1200_s29 }
 0x358   : > { %649 = vrot.lane.b32.xlu2 %v1352_v34, %s1201_s15  ;;  %s402_s15 = sand.u32 1, %s1180_s22  }
 0x39d   : > { %v516_v9 = vpop.xlane.xlu1 %515 }
 0x39e   : > { %1114 = vrcp.f32 %v516_v9  ;;  %v909_v9 = vld [vmem:[%s1530_s10 + $0x58] sm:$0xff] }
 0x3a4   : > { %v1115_v10 = vpop.eup %1114 }
 0x3a5   : > { %v518_v11 = vmul.f32 %v1115_v10, %v1107_v55  ;;  %v646_v13 = vpop.xlane.xlu0 %645  ;;  %v908_v10 = vld [vmem:[%s1530_s10 + $0x50] sm:$0xff] }
 0x3a7   : > { %1024 = vmatmul.msk.f32.vlgmr.msrb.gmra.mxu2 %vm483_vm6, %v518_v11 }
 0x3ab   : > { %v581_v12 = vpop.xlane.xlu2 %580 }
 0x3ac   : > { %1116 = vrcp.f32 %v581_v12 }
 0x3ad   : > { %1118 = vrcp.f32 %v646_v13  ;;  %v907_v13 = vld [vmem:[%s1530_s10 + $0x48] sm:$0xff] }
 0x3b2   : > { %v1117_v15 = vpop.eup %1116 }
 0x3b3   : > { %v711_v14 = vpop.xlane.xlu2 %710  ;;  %v1119_v16 = vpop.eup %1118  ;;  %v583_v17 = vmul.f32 %v1117_v15, %v1111_v3  ;;  %v913_v3 = vld [vmem:[%s1530_s10 + $0x78] sm:$0xff]  ;;  %v906_v15 = vld [vmem:[%s1530_s10 + $0x40] sm:$0xff] }
 0x3b4   : > { %1120 = vrcp.f32 %v711_v14  ;;  %v648_v21 = vmul.f32 %v1119_v16, %v1109_v61  ;;  %v1098_v61 = vld [vmem:[%s1526_s6] ss:$0 sm:$0xff]  ;;  %918 = vmatpush.msra.mxu0 %v913_v3 }
 0x3b5   : > { %v715_v19 = vpop.permute.xlu1 %714 }
 0x3b6   : > { %919 = vmatpush.msra.mxu0 %v912_v4 }
 0x3b8   : > { %v585_v18 = vpop.permute.xlu0 %584  ;;  %920 = vmatpush.msra.mxu0 %v911_v5 }
 0x3b9   : > { %605 = vmatpush.msra.mxu2 %v585_v18 }
 0x3ba   : > { %1027 = vmatmul.msk.f32.vlgmr.msra.gmra.mxu2 %vm483_vm6, %v583_v17  ;;  %v1121_v22 = vpop.eup %1120  ;;  %921 = vmatpush.msra.mxu0 %v910_v7  ;;  %v905_v17 = vld [vmem:[%s1530_s10 + $0x38] sm:$0xff] }
 0x3bb   : > { %735 = vmatpush.msrb.mxu2 %v715_v19  ;;  %v650_v20 = vpop.permute.xlu2 %649  ;;  %v713_v23 = vmul.f32 %v1121_v22, %v1113_v6  ;;  %v1100_v6 = vld [vmem:[%s1529_s9] ss:$0 sm:$0xff]  ;;  %v904_v19 = vld [vmem:[%s1530_s10 + $0x30] sm:$0xff] }
 0x3bc   : > { %670 = vmatpush.msrb.mxu3 %v650_v20  ;;  %922 = vmatpush.msra.mxu0 %v909_v9 }
 0x3bd   : > { %1030 = vmatmul.msk.f32.vlgmr.msrb.gmra.mxu3 %vm483_vm6, %v648_v21  ;;  %v903_v21 = vld [vmem:[%s1530_s10 + $0x28] sm:$0xff] }
 0x3be   : > { %846 = vmatpush.msra.mxu3 %v826_v49  ;;  %923 = vmatpush.msra.mxu0 %v908_v10 }
 0x3c0   : > { %924 = vmatpush.msra.mxu0 %v907_v13 }
 0x3c2   : > { %1033 = vmatmul.msk.f32.vlgmr.msrb.gmra.mxu2 %vm483_vm6, %v713_v23  ;;  %925 = vmatpush.msra.mxu0 %v906_v15 }
 0x3c4   : > { %926 = vmatpush.msra.mxu0 %v905_v17 }
 0x3c6   : > { %927 = vmatpush.msra.mxu0 %v904_v19 }
 0x3c8   : > { %928 = vmatpush.msra.mxu0 %v903_v21 }
 0x42a   : > { %v542_v24 = vpop.f32.mrf.mxu2 }
 0x43d   : > { %v607_v25 = vpop.f32.mrf.mxu2 }
 0x43e   : > { %741 = vrot.lane.b32.xlu0 %v607_v25, %s1202_s16  ;;  %s1019_s16 = sshll.u32 %s402_s15, 3 }
 0x43f   : > { %s404_s28 = scalar_lea.vmem [#allocation4], %s1019_s16  ;;  %s1146_s16 = scalar_lea.hbm %s1532_s12, 16 }
 0x440   : > { %v672_v26 = vpop.f32.mrf.mxu3  ;;  %s953_s29 = sshll.u32 %s404_s28, 4  ;;  %s954_s29 = int_to_ptr.vmem [resolvable:$true] %s953_s29 }
 0x441   : > { %745 = vrot.lane.b32.xlu1 %v672_v26, %s1203_s17  ;;  %s1038_s17 = sshll.u32 %s1291_s25, 3  ;;  %s941_s25 = scalar_lea.sflag [#allocation5], %s402_s15 }
 0x442   : > { %s951_s26 = scalar_lea.hbm %s1532_s12, %s1038_s17 }
 0x443   : > { %s955_s1 = sshll.u32 %s951_s26, 4  ;;  %s956_s1 = int_to_ptr.hbm [resolvable:$true] %s955_s1 }
 0x444   : > { %s1140_s2 = sshra.s32 %s956_s1, 4  ;;  %s1141_s2 = int_to_ptr.hbm [resolvable:$true] %s1140_s2 }
 0x445   : > { %v737_v27 = vpop.f32.mrf.mxu2  ;;  %p1147_p0 = scmp.lt.s32.totalorder %s1141_s2, %s1532_s12 }
 0x446   : > { %749 = vrot.lane.b32.xlu2 %v737_v27, %s1204_s18  ;;  %v901_v27 = vld [vmem:[%s1530_s10 + $0x18] sm:$0xff]  ;;  %s1142_s18 = scalar_lea.hbm %s1141_s2, 8 }
 0x447   : > { %p1143_p11 = scmp.ne.s32.totalorder %s1141_s2, %s1142_s18  ;;  %p1148_p1 = scmp.lt.s32.totalorder %s1146_s16, %s1142_s18 }
 0x449   : > { %p1144_p12 = pnand %p1143_p11, %p1308_p5  ;;  %p1149_p2 = por %p1148_p1, %p1147_p0 }
 0x44b   : > { %p1145_p13 = pneg %p1144_p12 }
 0x44d   : > { %p1150_p3 = pnand %p1149_p2, %p1145_p13 }
 0x4a0   : > { %v750_v35 = vpop.permute.xlu2 %749 }
 0x4b0   : > { %v742_v32 = vpop.permute.xlu0 %741 }
 0x4b1   : > { %v752_v33 = vsel %vm483_vm6, %v542_v24, %v742_v32  ;;  %v902_v24 = vld [vmem:[%s1530_s10 + $0x20] sm:$0xff]  ;;  %v899_v32 = vld [vmem:[%s1530_s10 + $0x8] sm:$0xff] }
 0x4b2   : > { %929 = vmatpush.msra.mxu0 %v902_v24 }
 0x4b3   : > { %v746_v34 = vpop.permute.xlu1 %745 }
 0x4b4   : > { %v754_v36 = vsel %vm753_vm7, %v752_v33, %v746_v34  ;;  %930 = vmatpush.msra.mxu0 %v901_v27  ;;  %v898_v34 = vld [vmem:[%s1530_s10] sm:$0xff] }
 0x4b5   : > { %v756_v37 = vsel %vm755_vm8, %v754_v36, %v750_v35 }
 0x4b6   : > { %757 = vst.msk [vmem:[#allocation3] sm:$0xff] %vm412_vm0, %v756_v37  ;;  %931 = vmatpush.msra.mxu0 %v900_v29 }
 0x4b8   : > { %932 = vmatpush.msra.mxu0 %v899_v32 }
 0x4ba   : > { %933 = vmatpush.msra.mxu0 %v898_v34 }
 0x4bd   : > { %v758_v38 = vld [vmem:[#allocation3] sm:$0xff] }
 0x4be   : > { %1034 = vmatmul.msk.f32.vlgmr.msrb.gmra.mxu1 %vm412_vm0, %v758_v38 }
 0x53b   : > { %v787_v40 = vpop.f32.mrf.mxu1 }
 0x53c   : > { %v788_v41 = vadd.f32 %v1097_v39, %v787_v40 }
 0x53e   : > { %v1405_v42 = vadd.f32 %v788_v41, %v1323_v0  ;;  %v825_v0 = vld [vmem:[%s1528_s8 + $0x10] sm:$0xff] }
 0x53f   : > { %847 = vmatpush.msra.mxu3 %v825_v0 }
 0x540   : > { %v793_v43 = vsel %vm412_vm0, %v1405_v42, 0.0 }
 0x541   : > { %794 = vadd.xlane.f32.xlu0 %v793_v43  ;;  %848 = vmatpush.msra.mxu3 %v824_v50 }
 0x543   : > { %849 = vmatpush.msra.mxu3 %v823_v51 }
 0x5b4   : > { %v795_v44 = vpop.xlane.xlu0 %794 }
 0x5b5   : > { %v796_v45 = vmul.f32 %v795_v44, %v1327_v8 }
 0x5b7   : > { %v797_v46 = vsub.f32 %v1405_v42, %v796_v45 }
 0x5b9   : > { %v798_v47 = vmul.f32 %v797_v46, %v797_v46 }
 0x5bb   : > { %v799_v48 = vsel %vm412_vm0, %v798_v47, 0.0 }
 0x5bc   : > { %800 = vadd.xlane.f32.xlu1 %v799_v48 }
 0x62f   : > { %v801_v52 = vpop.xlane.xlu1 %800 }
 0x630   : > { %v802_v53 = vmul.f32 %v801_v52, %v1327_v8  ;;  %v1099_v8 = vld [vmem:[%s1527_s7] ss:$0 sm:$0xff] }
 0x632   : > { %v803_v54 = vadd.f32 1e-05, %v802_v53 }
 0x634   : > { %1122 = vrsqrt.f32 %v803_v54  ;;  %vm810_vm10 = vweird.f32 %v803_v54 }
 0x63a   : > { %v1123_v55 = vpop.eup %1122 }
 0x63b   : > { %v805_v56 = vmul.f32 %v1123_v55, %v803_v54  ;;  %vm811_vm9 = vweird.f32 %v1123_v55 }
 0x63c   : > { %vm812_vm11 = vmor %vm810_vm10, %vm811_vm9 }
 0x63d   : > { %v806_v57 = vmul.f32 %v1123_v55, %v805_v56 }
 0x63f   : > { %v807_v58 = vmul.f32 0.5, %v806_v57 }
 0x641   : > { %v808_v59 = vsub.f32 1.5, %v807_v58 }
 0x643   : > { %v809_v60 = vmul.f32 %v1123_v55, %v808_v59 }
 0x645   : > { %v813_v62 = vsel %vm812_vm11, %v1123_v55, %v809_v60 }
 0x646   : > { %v814_v63 = vmul.f32 %v813_v62, %v797_v46  ;;  %v1101_v62 = vld [vmem:[%s1531_s11] ss:$0 sm:$0xff] }
 0x648   : > { %v818_v1 = vmul.f32 %v1098_v61, %v814_v63 }
 0x64a   : > { %v822_v2 = vadd.f32 %v1099_v8, %v818_v1 }
 0x64c   : > { %1035 = vmatmul.msk.f32.vlgmr.msra.gmra.mxu3 %vm412_vm0, %v822_v2 }
 0x6cf   : > { %v851_v11 = vpop.f32.mrf.mxu3 }
 0x6d0   : > { %v852_v12 = vadd.f32 %v1100_v6, %v851_v11 }
 0x6d2   : > { %v855_v14 = vmul.f32 0.70710677, %v852_v12  ;;  %v854_v59 = vmul.f32 0.5, %v852_v12 }
 0x6d4   : > { %v856_v16 = vmul.f32 %v855_v14, %v855_v14 }
 0x6d6   : > { %v857_v18 = vmin.f32 %v856_v16, 16.0 }
 0x6d8   : > { %v858_v20 = vmul.f32 2.1237322e-06, %v857_v18  ;;  %v869_v22 = vmul.f32 3.8918573e-05, %v857_v18 }
 0x6da   : > { %v859_v23 = vadd.f32 0.00028619796, %v858_v20  ;;  %v870_v25 = vadd.f32 0.001143296, %v869_v22 }
 0x6dc   : > { %v860_v26 = vmul.f32 %v859_v23, %v857_v18  ;;  %v871_v28 = vmul.f32 %v870_v25, %v857_v18 }
 0x6de   : > { %v872_v30 = vadd.f32 0.014752088, %v871_v28  ;;  %v861_v31 = vadd.f32 0.0036580483, %v860_v26 }
 0x6e0   : > { %v873_v33 = vmul.f32 %v872_v30, %v857_v18  ;;  %v862_v36 = vmul.f32 %v861_v31, %v857_v18 }
 0x6e2   : > { %v874_v35 = vadd.f32 0.112945676, %v873_v33  ;;  %v863_v39 = vadd.f32 0.05243302, %v862_v36 }
 0x6e4   : > { %v875_v37 = vmul.f32 %v874_v35, %v857_v18  ;;  %v864_v43 = vmul.f32 %v863_v39, %v857_v18 }
 0x6e6   : > { %v876_v38 = vadd.f32 0.4994258, %v875_v37  ;;  %v865_v44 = vadd.f32 0.18741608, %v864_v43 }
 0x6e8   : > { %v877_v40 = vmul.f32 %v876_v38, %v857_v18  ;;  %v866_v46 = vmul.f32 %v865_v44, %v857_v18 }
 0x6ea   : > { %v878_v41 = vadd.f32 1.0, %v877_v40  ;;  %v867_v0 = vadd.f32 1.1283791, %v866_v46 }
 0x6ec   : > { %1124 = vrcp.f32 %v878_v41  ;;  %v890_v49 = vand.u32 2147483648, %v878_v41  ;;  %v888_v51 = vand.u32 2147483647, %v878_v41  ;;  %vm884_vm13 = vweird.f32 %v878_v41 }
 0x6ed   : > { %v868_v54 = vmul.f32 %v867_v0, %v855_v14 }
 0x6ee   : > { %v891_v53 = vor.u32 1.1754944e-38, %v890_v49  ;;  %vm889_vm15 = vcmp.eq.f32.partialorder %v888_v51, 8.507059e+37 }
 0x6f2   : > { %v1125_v45 = vpop.eup %1124 }
 0x6f3   : > { %v880_v47 = vmul.f32 %v1125_v45, %v878_v41  ;;  %vm885_vm12 = vweird.f32 %v1125_v45 }
 0x6f4   : > { %vm886_vm14 = vmor %vm884_vm13, %vm885_vm12 }
 0x6f5   : > { %v881_v48 = vsub.f32 1.0, %v880_v47 }
 0x6f7   : > { %v882_v50 = vmul.f32 %v1125_v45, %v881_v48 }
 0x6f9   : > { %v883_v52 = vadd.f32 %v1125_v45, %v882_v50 }
 0x6fb   : > { %v887_v55 = vsel %vm886_vm14, %v1125_v45, %v883_v52 }
 0x6fc   : > { %v892_v56 = vsel %vm889_vm15, %v891_v53, %v887_v55 }
 0x6fd   : > { %v893_v57 = vmul.f32 %v892_v56, %v868_v54 }
 0x6ff   : > { %v1036_v58 = vclamps-f32 %v893_v57, 1.0 }
 0x701   : > { %v896_v60 = vadd.f32 1.0, %v1036_v58 }
 0x703   : > { %v897_v61 = vmul.f32 %v896_v60, %v854_v59 }
 0x705   : > { %934 = vmatmul.f32.vlgmr.msra.gmra.mxu0 %v897_v61 }
 0x782   : > { %v935_v63 = vpop.f32.mrf.mxu0 }
 0x783   : > { %v936_v8 = vadd.f32 %v1101_v62, %v935_v63 }
 0x785   : > { %v938_v1 = vadd.f32 %v936_v8, %v1405_v42 }
 0x787   : > { %939 = vst.msk [vmem:[%s404_s28] sm:$0xff] %vm412_vm0, %v938_v1 }
 0x788   : > { %1153 = shalt.err (!%p1150_p3)
}
 0x789   : > { %1041 = dma.vmem_to_hbm [thread:$0]  (%p1308_p5), %s954_s29, 128, %s956_s1, %s941_s25  }
 0x78a PF: > { %p1047_p4 = scmp.ge.s32.totalorder %s1188_s24, 2  ;;  %s967_s15 = sand.u32 1, %s1176_s21  }
 0x78b   : > { %s968_s26 = scalar_lea.sflag [#allocation5], %s967_s15 }
 0x78c   : > { %p1044_p7 = pnand %p1047_p4, %p1312_p6 }
 0x78e   : > { %p1045_p8 = pneg %p1044_p7 }
 0x790   : > { %1171 = dma.done.wait (%p1045_p8), %s968_s26, 128  }
 0x791   : > { %1173 = vsyncadd (%p1045_p8), %s968_s26, 4294967168  ;;  %p22_p9 = scmp.ge.s32.totalorder %s1295_s27, 4   ;;  %s1541_s21 = smov %s1180_s22 }
 0x792   : > { %s1542_s22 = smov %s1184_s23  ;;  %s1543_s23 = smov %s1306_s30 }
 0x793   : > { %s1544_s24 = smov %s1295_s27  ;;  %24 = sbr.rel (!%p22_p9) target bundleno = 7 (0x7), region = 103 }
 0x798   :  { %974 = vsyncpa [#allocation5], 1 }
 0x799   :  { %976 = vsyncpa [#allocation5 + $0x1], 1 }

</bundles_post_ra>
